<compile_context>
chip_gen: v6e
topology: v6e:2x2x1
jax: 0.10.0
libtpu: 0.0.40
codegen_flags: <defaults>
</compile_context>

<pallas_src>
import math
import jax
import jax.numpy as jnp
from jax.experimental import pallas as pl
from jax.experimental.pallas import tpu as pltpu


def _block_kernel(x_ref,
                  ln1_w_ref, ln1_b_ref,
                  tmk_ref, tmv_ref, tmr_ref, tdecay_ref, tfirst_ref,
                  wk_ref, wv_ref, wr_ref, wo_ref,
                  ln2_w_ref, ln2_b_ref,
                  ftmk_ref, ftmr_ref, fwk_ref, fwr_ref, fwv_ref,
                  o_ref,
                  k_scr, v_scr, y_scr):
    T, Bb, C = x_ref.shape
    M = T * Bb

    # Work in f32 internally regardless of activation dtype.
    x = x_ref[...].astype(jnp.float32).reshape(M, C)      # (M, C), M = T*Bb

    def layernorm(z, w, b):
        mu = jnp.mean(z, axis=-1, keepdims=True)
        var = jnp.mean(jnp.square(z - mu), axis=-1, keepdims=True)
        return (z - mu) * jax.lax.rsqrt(var + 1e-5) * w + b

    def time_shift(z):
        # nn.ZeroPad2d((0,0,1,-1)) per batch row: (t, b) gets (t-1, b), t=0 -> 0.
        # In the (T*Bb, C) flattening this is a shift by Bb rows.
        rolled = pltpu.roll(z, shift=Bb, axis=0)
        rows = jax.lax.broadcasted_iota(jnp.int32, z.shape, 0)
        return jnp.where(rows < Bb, 0.0, rolled)

    # ---------------- attention path (RWKV_TimeMix) ----------------
    xln = layernorm(x, ln1_w_ref[...], ln1_b_ref[...])
    xx = time_shift(xln)
    d = xln - xx
    xk = xx + tmk_ref[...] * d          # == xln*tmk + xx*(1-tmk)
    xv = xx + tmv_ref[...] * d
    xr = xx + tmr_ref[...] * d

    k = jnp.dot(xk.astype(jnp.bfloat16), wk_ref[...],
                preferred_element_type=jnp.float32)        # (M, C)
    v = jnp.dot(xv.astype(jnp.bfloat16), wv_ref[...],
                preferred_element_type=jnp.float32)        # (M, C)
    r = jax.nn.sigmoid(jnp.dot(xr.astype(jnp.bfloat16), wr_ref[...],
                               preferred_element_type=jnp.float32))

    # bf16 rounding at the WKV boundary (matches wkv_cuda's bf16 path),
    # then f32 accumulation inside the recurrence.
    k_scr[...] = k.astype(jnp.bfloat16).astype(jnp.float32).reshape(T, Bb, C)
    v_scr[...] = v.astype(jnp.bfloat16).astype(jnp.float32).reshape(T, Bb, C)

    w = -jnp.exp(tdecay_ref[...])                                   # (1, C) f32
    u = tfirst_ref[...].astype(jnp.bfloat16).astype(jnp.float32)    # (1, C)

    def wkv_step(t, carry):
        aa, bb_, pp = carry                      # each (Bb, C) f32
        kt = k_scr[t]                            # (Bb, C)
        vt = v_scr[t]
        ww = u + kt
        p = jnp.maximum(pp, ww)
        e1 = jnp.exp(pp - p)
        e2 = jnp.exp(ww - p)
        num = e1 * aa + e2 * vt
        den = e1 * bb_ + e2
        y_scr[t] = num * pl.reciprocal(den, approx=True)
        ww2 = pp + w
        p2 = jnp.maximum(ww2, kt)
        e1b = jnp.exp(ww2 - p2)
        e2b = jnp.exp(kt - p2)
        return (e1b * aa + e2b * vt, e1b * bb_ + e2b, p2)

    init = (jnp.zeros((Bb, C), jnp.float32),
            jnp.zeros((Bb, C), jnp.float32),
            jnp.full((Bb, C), -1e38, jnp.float32))
    _ = jax.lax.fori_loop(0, T, wkv_step, init)

    y = y_scr[...].reshape(M, C).astype(jnp.bfloat16)      # CUDA kernel emits bf16
    rwkv = (r * y.astype(jnp.float32)).astype(jnp.bfloat16)
    att_out = jnp.dot(rwkv, wo_ref[...], preferred_element_type=jnp.float32)
    x1 = x + att_out                                        # first residual

    # ---------------- ffn path (RWKV_ChannelMix) ----------------
    zln = layernorm(x1, ln2_w_ref[...], ln2_b_ref[...])
    zz = time_shift(zln)
    df = zln - zz
    zk = zz + ftmk_ref[...] * df
    zr = zz + ftmr_ref[...] * df

    rf = jax.nn.sigmoid(jnp.dot(zr.astype(jnp.bfloat16), fwr_ref[...],
                                preferred_element_type=jnp.float32))   # (M, C)

    # Chunk the 4C hidden dim so the (M, 4C) intermediate never fully
    # materializes at large C.
    zk_b = zk.astype(jnp.bfloat16)
    H = fwk_ref.shape[1]
    Hc = min(H, 512)
    ffn_kv = jnp.zeros((M, C), jnp.float32)
    for h0 in range(0, H, Hc):
        h1 = min(h0 + Hc, H)
        kf = jnp.dot(zk_b, fwk_ref[:, h0:h1],
                     preferred_element_type=jnp.float32)
        kf = jnp.square(jnp.maximum(kf, 0.0)).astype(jnp.bfloat16)     # relu^2
        ffn_kv = ffn_kv + jnp.dot(kf, fwv_ref[h0:h1, :],
                                  preferred_element_type=jnp.float32)

    out = x1 + rf * ffn_kv                                  # second residual
    o_ref[...] = out.reshape(T, Bb, C).astype(o_ref.dtype)


# indices of the linear weights (cast to bf16 for the MXU)
_BF16_WEIGHT_IDX = (7, 8, 9, 10, 15, 16, 17)


def rwkv_block(x, params, block_batch=8):
    """x: (B, T, C) float32. params: list from init_params."""
    B, T, C = x.shape
    # Bb must either be a multiple of 8 that divides B, or the full batch
    # (Mosaic (8,128) block-shape rule on the trailing-two dims).
    Bb = block_batch if (B % block_batch == 0) else B

    xt = jnp.transpose(x, (1, 0, 2))                        # (T, B, C)
    kparams = [p.astype(jnp.bfloat16) if i in _BF16_WEIGHT_IDX
               else p.astype(jnp.float32)
               for i, p in enumerate(params)]

    in_specs = [pl.BlockSpec((T, Bb, C), lambda i: (0, i, 0))]
    for p in kparams:
        nd = p.ndim
        # Grid-invariant blocks (constant index_map) -> not re-fetched across
        # grid steps.  (pl.Buffered(1) single-buffering intentionally not used
        # here to keep the lowering conservative.)
        in_specs.append(pl.BlockSpec(p.shape, lambda i, _nd=nd: (0,) * _nd))

    out_t = pl.pallas_call(
        _block_kernel,
        out_shape=jax.ShapeDtypeStruct((T, B, C), x.dtype),
        grid_spec=pltpu.PrefetchScalarGridSpec(
            num_scalar_prefetch=0,
            grid=(B // Bb,),
            in_specs=in_specs,
            out_specs=pl.BlockSpec((T, Bb, C), lambda i: (0, i, 0)),
            scratch_shapes=[
                pltpu.VMEM((T, Bb, C), jnp.float32),   # k (bf16-rounded)
                pltpu.VMEM((T, Bb, C), jnp.float32),   # v (bf16-rounded)
                pltpu.VMEM((T, Bb, C), jnp.float32),   # y (WKV output rows)
            ]),
        compiler_params=pltpu.CompilerParams(
            dimension_semantics=("parallel",),
            vmem_limit_bytes=48 * 1024 * 1024),
    )(xt, *kparams)

    return jnp.transpose(out_t, (1, 0, 2))                  # back to (B, T, C)


def init_params(key, C, layer_id=0, n_layer=2):
    """Deterministic parameter construction mirroring Block.__init__ shapes."""
    H = 4 * C
    ratio_0_to_1 = layer_id / (n_layer - 1)
    ratio_1_to_almost0 = 1.0 - layer_id / n_layer

    idx = jnp.arange(C, dtype=jnp.float32)
    xratio = idx / C
    time_mix_k = (xratio ** ratio_1_to_almost0).reshape(1, C)
    time_mix_v = (xratio ** ratio_1_to_almost0 + 0.3 * ratio_0_to_1).reshape(1, C)
    time_mix_r = (xratio ** (0.5 * ratio_1_to_almost0)).reshape(1, C)

    decay_speed = -5.0 + 8.0 * (idx / (C - 1)) ** (0.7 + 1.3 * ratio_0_to_1)
    zigzag = ((jnp.arange(C) + 1) % 3 - 1).astype(jnp.float32) * 0.5
    time_first = jnp.full((C,), math.log(0.3), jnp.float32) + zigzag

    ks = jax.random.split(key, 7)

    def lin(k, fan_in, fan_out):
        # stored as (in, out): kernel does x @ W  (== torch x @ weight.T)
        return jax.random.normal(k, (fan_in, fan_out), jnp.float32) / math.sqrt(fan_in)

    return [
        jnp.ones((1, C), jnp.float32), jnp.zeros((1, C), jnp.float32),   # ln1 w, b
        time_mix_k, time_mix_v, time_mix_r,                              # att mixes
        decay_speed.reshape(1, C), time_first.reshape(1, C),             # time_decay, time_first
        lin(ks[0], C, C), lin(ks[1], C, C), lin(ks[2], C, C), lin(ks[3], C, C),  # att K,V,R,O
        jnp.ones((1, C), jnp.float32), jnp.zeros((1, C), jnp.float32),   # ln2 w, b
        time_mix_k, time_mix_k,                                          # ffn time_mix_k, _r
        lin(ks[4], C, H), lin(ks[5], C, C), lin(ks[6], H, C),            # ffn K, R, V
    ]


if __name__ == "__main__":
    B, T, C = 2, 8, 32
    key = jax.random.PRNGKey(0)
    kx, kp = jax.random.split(key)
    x = jax.random.normal(kx, (B, T, C), jnp.float32)
    params = init_params(kp, C, layer_id=0, n_layer=2)

    out = rwkv_block(x, params)
    jax.block_until_ready(out)
    assert out.shape == (B, T, C) and out.dtype == jnp.float32
    print("KERNEL_OK")
</pallas_src>

<mosaic_0001>
module attributes {stable_mosaic.version = 11 : i64} {
  func.func @_block_kernel(%arg0: i32, %arg1: memref<8x2x32xf32, #tpu.memory_space<vmem>>, %arg2: memref<1x32xf32, #tpu.memory_space<vmem>>, %arg3: memref<1x32xf32, #tpu.memory_space<vmem>>, %arg4: memref<1x32xf32, #tpu.memory_space<vmem>>, %arg5: memref<1x32xf32, #tpu.memory_space<vmem>>, %arg6: memref<1x32xf32, #tpu.memory_space<vmem>>, %arg7: memref<1x32xf32, #tpu.memory_space<vmem>>, %arg8: memref<1x32xf32, #tpu.memory_space<vmem>>, %arg9: memref<32x32xbf16, #tpu.memory_space<vmem>>, %arg10: memref<32x32xbf16, #tpu.memory_space<vmem>>, %arg11: memref<32x32xbf16, #tpu.memory_space<vmem>>, %arg12: memref<32x32xbf16, #tpu.memory_space<vmem>>, %arg13: memref<1x32xf32, #tpu.memory_space<vmem>>, %arg14: memref<1x32xf32, #tpu.memory_space<vmem>>, %arg15: memref<1x32xf32, #tpu.memory_space<vmem>>, %arg16: memref<1x32xf32, #tpu.memory_space<vmem>>, %arg17: memref<32x128xbf16, #tpu.memory_space<vmem>>, %arg18: memref<32x32xbf16, #tpu.memory_space<vmem>>, %arg19: memref<128x32xbf16, #tpu.memory_space<vmem>>, %arg20: memref<8x2x32xf32, #tpu.memory_space<vmem>>, %arg21: memref<8x2x32xf32, #tpu.memory_space<vmem>>, %arg22: memref<8x2x32xf32, #tpu.memory_space<vmem>>, %arg23: memref<8x2x32xf32, #tpu.memory_space<vmem>>) attributes {dimension_semantics = [#tpu.dimension_semantics<parallel>], iteration_bounds = array<i64: 1>, scalar_prefetch = 0 : i64, scratch_operands = 3 : i64, tpu.core_type = #tpu.core_type<tc>, window_params = [{transform_indices = @transform_0, window_bounds = array<i64: 8, 2, 32>}, {pipeline_mode = #tpu.pipeline_mode<synchronous>, transform_indices = @transform_1, window_bounds = array<i64: 1, 32>}, {pipeline_mode = #tpu.pipeline_mode<synchronous>, transform_indices = @transform_2, window_bounds = array<i64: 1, 32>}, {pipeline_mode = #tpu.pipeline_mode<synchronous>, transform_indices = @transform_3, window_bounds = array<i64: 1, 32>}, {pipeline_mode = #tpu.pipeline_mode<synchronous>, transform_indices = @transform_4, window_bounds = array<i64: 1, 32>}, {pipeline_mode = #tpu.pipeline_mode<synchronous>, transform_indices = @transform_5, window_bounds = array<i64: 1, 32>}, {pipeline_mode = #tpu.pipeline_mode<synchronous>, transform_indices = @transform_6, window_bounds = array<i64: 1, 32>}, {pipeline_mode = #tpu.pipeline_mode<synchronous>, transform_indices = @transform_7, window_bounds = array<i64: 1, 32>}, {pipeline_mode = #tpu.pipeline_mode<synchronous>, transform_indices = @transform_8, window_bounds = array<i64: 32, 32>}, {pipeline_mode = #tpu.pipeline_mode<synchronous>, transform_indices = @transform_9, window_bounds = array<i64: 32, 32>}, {pipeline_mode = #tpu.pipeline_mode<synchronous>, transform_indices = @transform_10, window_bounds = array<i64: 32, 32>}, {pipeline_mode = #tpu.pipeline_mode<synchronous>, transform_indices = @transform_11, window_bounds = array<i64: 32, 32>}, {pipeline_mode = #tpu.pipeline_mode<synchronous>, transform_indices = @transform_12, window_bounds = array<i64: 1, 32>}, {pipeline_mode = #tpu.pipeline_mode<synchronous>, transform_indices = @transform_13, window_bounds = array<i64: 1, 32>}, {pipeline_mode = #tpu.pipeline_mode<synchronous>, transform_indices = @transform_14, window_bounds = array<i64: 1, 32>}, {pipeline_mode = #tpu.pipeline_mode<synchronous>, transform_indices = @transform_15, window_bounds = array<i64: 1, 32>}, {pipeline_mode = #tpu.pipeline_mode<synchronous>, transform_indices = @transform_16, window_bounds = array<i64: 32, 128>}, {pipeline_mode = #tpu.pipeline_mode<synchronous>, transform_indices = @transform_17, window_bounds = array<i64: 32, 32>}, {pipeline_mode = #tpu.pipeline_mode<synchronous>, transform_indices = @transform_18, window_bounds = array<i64: 128, 32>}, {transform_indices = @transform_19, window_bounds = array<i64: 8, 2, 32>}]} {
    %c0 = arith.constant 0 : index
    %c0_0 = arith.constant 0 : index
    %c0_1 = arith.constant 0 : index
    %0 = vector.load %arg1[%c0, %c0_0, %c0_1] : memref<8x2x32xf32, #tpu.memory_space<vmem>>, vector<8x2x32xf32>
    %1 = vector.shape_cast %0 : vector<8x2x32xf32> to vector<16x32xf32>
    %c0_2 = arith.constant 0 : index
    %c0_3 = arith.constant 0 : index
    %2 = vector.load %arg2[%c0_2, %c0_3] : memref<1x32xf32, #tpu.memory_space<vmem>>, vector<1x32xf32>
    %c0_4 = arith.constant 0 : index
    %c0_5 = arith.constant 0 : index
    %3 = vector.load %arg3[%c0_4, %c0_5] : memref<1x32xf32, #tpu.memory_space<vmem>>, vector<1x32xf32>
    %cst = arith.constant dense<0.000000e+00> : vector<16xf32>
    %4 = vector.multi_reduction <add>, %1, %cst [1] : vector<16x32xf32> to vector<16xf32>
    %5 = vector.shape_cast %4 : vector<16xf32> to vector<16x1xf32>
    %cst_6 = arith.constant 3.200000e+01 : f32
    %6 = vector.broadcast %cst_6 : f32 to vector<16x1xf32>
    %7 = arith.divf %5, %6 : vector<16x1xf32>
    %8 = vector.broadcast %7 : vector<16x1xf32> to vector<16x32xf32>
    %9 = arith.subf %1, %8 : vector<16x32xf32>
    %10 = arith.mulf %9, %9 : vector<16x32xf32>
    %cst_7 = arith.constant dense<0.000000e+00> : vector<16xf32>
    %11 = vector.multi_reduction <add>, %10, %cst_7 [1] : vector<16x32xf32> to vector<16xf32>
    %12 = vector.shape_cast %11 : vector<16xf32> to vector<16x1xf32>
    %cst_8 = arith.constant 3.200000e+01 : f32
    %13 = vector.broadcast %cst_8 : f32 to vector<16x1xf32>
    %14 = arith.divf %12, %13 : vector<16x1xf32>
    %15 = vector.broadcast %7 : vector<16x1xf32> to vector<16x32xf32>
    %16 = arith.subf %1, %15 : vector<16x32xf32>
    %cst_9 = arith.constant 9.99999974E-6 : f32
    %17 = vector.broadcast %cst_9 : f32 to vector<16x1xf32>
    %18 = arith.addf %14, %17 : vector<16x1xf32>
    %19 = math.rsqrt %18 : vector<16x1xf32>
    %20 = vector.broadcast %19 : vector<16x1xf32> to vector<16x32xf32>
    %21 = arith.mulf %16, %20 : vector<16x32xf32>
    %22 = vector.broadcast %2 : vector<1x32xf32> to vector<16x32xf32>
    %23 = arith.mulf %21, %22 : vector<16x32xf32>
    %24 = vector.broadcast %3 : vector<1x32xf32> to vector<16x32xf32>
    %25 = arith.addf %23, %24 : vector<16x32xf32>
    %c2_i32 = arith.constant 2 : i32
    %26 = tpu.dynamic_rotate %25 by %c2_i32 dim 0 : vector<16x32xf32>, i32 -> vector<16x32xf32>
    %27 = tpu.iota {dimensions = array<i32: 0>} : vector<16x32xi32>
    %c2_i32_10 = arith.constant 2 : i32
    %28 = vector.broadcast %c2_i32_10 : i32 to vector<16x32xi32>
    %29 = arith.cmpi slt, %27, %28 : vector<16x32xi32>
    %cst_11 = arith.constant 0.000000e+00 : f32
    %30 = vector.broadcast %cst_11 : f32 to vector<16x32xf32>
    %31 = arith.select %29, %30, %26 : vector<16x32xi1>, vector<16x32xf32>
    %32 = arith.subf %25, %31 : vector<16x32xf32>
    %c0_12 = arith.constant 0 : index
    %c0_13 = arith.constant 0 : index
    %33 = vector.load %arg4[%c0_12, %c0_13] : memref<1x32xf32, #tpu.memory_space<vmem>>, vector<1x32xf32>
    %34 = vector.broadcast %33 : vector<1x32xf32> to vector<16x32xf32>
    %35 = arith.mulf %34, %32 : vector<16x32xf32>
    %36 = arith.addf %31, %35 : vector<16x32xf32>
    %c0_14 = arith.constant 0 : index
    %c0_15 = arith.constant 0 : index
    %37 = vector.load %arg5[%c0_14, %c0_15] : memref<1x32xf32, #tpu.memory_space<vmem>>, vector<1x32xf32>
    %38 = vector.broadcast %37 : vector<1x32xf32> to vector<16x32xf32>
    %39 = arith.mulf %38, %32 : vector<16x32xf32>
    %40 = arith.addf %31, %39 : vector<16x32xf32>
    %c0_16 = arith.constant 0 : index
    %c0_17 = arith.constant 0 : index
    %41 = vector.load %arg6[%c0_16, %c0_17] : memref<1x32xf32, #tpu.memory_space<vmem>>, vector<1x32xf32>
    %42 = vector.broadcast %41 : vector<1x32xf32> to vector<16x32xf32>
    %43 = arith.mulf %42, %32 : vector<16x32xf32>
    %44 = arith.addf %31, %43 : vector<16x32xf32>
    %45 = arith.truncf %36 : vector<16x32xf32> to vector<16x32xbf16>
    %c0_18 = arith.constant 0 : index
    %c0_19 = arith.constant 0 : index
    %46 = vector.load %arg9[%c0_18, %c0_19] : memref<32x32xbf16, #tpu.memory_space<vmem>>, vector<32x32xbf16>
    %cst_20 = arith.constant dense<0.000000e+00> : vector<16x32xf32>
    %47 = tpu.matmul %45, %46, %cst_20 {dimension_numbers = #tpu.dot_dimension_numbers<[1], [0], [0], [1], [0, 0, 1, 1], [], []>} : vector<16x32xbf16>, vector<32x32xbf16>, vector<16x32xf32> -> vector<16x32xf32>
    %48 = arith.truncf %40 : vector<16x32xf32> to vector<16x32xbf16>
    %c0_21 = arith.constant 0 : index
    %c0_22 = arith.constant 0 : index
    %49 = vector.load %arg10[%c0_21, %c0_22] : memref<32x32xbf16, #tpu.memory_space<vmem>>, vector<32x32xbf16>
    %cst_23 = arith.constant dense<0.000000e+00> : vector<16x32xf32>
    %50 = tpu.matmul %48, %49, %cst_23 {dimension_numbers = #tpu.dot_dimension_numbers<[1], [0], [0], [1], [0, 0, 1, 1], [], []>} : vector<16x32xbf16>, vector<32x32xbf16>, vector<16x32xf32> -> vector<16x32xf32>
    %51 = arith.truncf %44 : vector<16x32xf32> to vector<16x32xbf16>
    %c0_24 = arith.constant 0 : index
    %c0_25 = arith.constant 0 : index
    %52 = vector.load %arg11[%c0_24, %c0_25] : memref<32x32xbf16, #tpu.memory_space<vmem>>, vector<32x32xbf16>
    %cst_26 = arith.constant dense<0.000000e+00> : vector<16x32xf32>
    %53 = tpu.matmul %51, %52, %cst_26 {dimension_numbers = #tpu.dot_dimension_numbers<[1], [0], [0], [1], [0, 0, 1, 1], [], []>} : vector<16x32xbf16>, vector<32x32xbf16>, vector<16x32xf32> -> vector<16x32xf32>
    %54 = arith.negf %53 : vector<16x32xf32>
    %55 = math.exp %54 : vector<16x32xf32>
    %cst_27 = arith.constant 1.000000e+00 : f32
    %56 = vector.broadcast %cst_27 : f32 to vector<16x32xf32>
    %57 = arith.addf %56, %55 : vector<16x32xf32>
    %58 = arith.divf %56, %57 : vector<16x32xf32>
    %59 = arith.truncf %47 : vector<16x32xf32> to vector<16x32xbf16>
    %60 = arith.extf %59 : vector<16x32xbf16> to vector<16x32xf32>
    %61 = vector.shape_cast %60 : vector<16x32xf32> to vector<8x2x32xf32>
    %c0_28 = arith.constant 0 : index
    %c0_29 = arith.constant 0 : index
    %c0_30 = arith.constant 0 : index
    %62 = vector.load %arg21[%c0_28, %c0_29, %c0_30] : memref<8x2x32xf32, #tpu.memory_space<vmem>>, vector<8x2x32xf32>
    tpu.vector_store %arg21[%c0_28, %c0_29, %c0_30], %61 {strides = array<i32>} : memref<8x2x32xf32, #tpu.memory_space<vmem>>, vector<8x2x32xf32>,
    %63 = arith.truncf %50 : vector<16x32xf32> to vector<16x32xbf16>
    %64 = arith.extf %63 : vector<16x32xbf16> to vector<16x32xf32>
    %65 = vector.shape_cast %64 : vector<16x32xf32> to vector<8x2x32xf32>
    %c0_31 = arith.constant 0 : index
    %c0_32 = arith.constant 0 : index
    %c0_33 = arith.constant 0 : index
    %66 = vector.load %arg22[%c0_31, %c0_32, %c0_33] : memref<8x2x32xf32, #tpu.memory_space<vmem>>, vector<8x2x32xf32>
    tpu.vector_store %arg22[%c0_31, %c0_32, %c0_33], %65 {strides = array<i32>} : memref<8x2x32xf32, #tpu.memory_space<vmem>>, vector<8x2x32xf32>,
    %c0_34 = arith.constant 0 : index
    %c0_35 = arith.constant 0 : index
    %67 = vector.load %arg7[%c0_34, %c0_35] : memref<1x32xf32, #tpu.memory_space<vmem>>, vector<1x32xf32>
    %68 = math.exp %67 : vector<1x32xf32>
    %cst_36 = arith.constant 0.000000e+00 : f32
    %69 = vector.broadcast %cst_36 : f32 to vector<1x32xf32>
    %70 = arith.subf %69, %68 : vector<1x32xf32>
    %c0_37 = arith.constant 0 : index
    %c0_38 = arith.constant 0 : index
    %71 = vector.load %arg8[%c0_37, %c0_38] : memref<1x32xf32, #tpu.memory_space<vmem>>, vector<1x32xf32>
    %72 = arith.truncf %71 : vector<1x32xf32> to vector<1x32xbf16>
    %73 = arith.extf %72 : vector<1x32xbf16> to vector<1x32xf32>
    %cst_39 = arith.constant 0.000000e+00 : f32
    %74 = vector.broadcast %cst_39 : f32 to vector<2x32xf32>
    %cst_40 = arith.constant 0.000000e+00 : f32
    %75 = vector.broadcast %cst_40 : f32 to vector<2x32xf32>
    %cst_41 = arith.constant -9.99999968E+37 : f32
    %76 = vector.broadcast %cst_41 : f32 to vector<2x32xf32>
    %c0_i32 = arith.constant 0 : i32
    %c8_i32 = arith.constant 8 : i32
    %77 = arith.addi %c0_i32, %c8_i32 : i32
    %c1_i32 = arith.constant 1 : i32
    %78:3 = scf.for %arg24 = %c0_i32 to %77 step %c1_i32 iter_args(%arg25 = %74, %arg26 = %75, %arg27 = %76) -> (vector<2x32xf32>, vector<2x32xf32>, vector<2x32xf32>)  : i32 {
      %150 = arith.index_cast %arg24 : i32 to index
      %c0_80 = arith.constant 0 : index
      %c0_81 = arith.constant 0 : index
      %151 = vector.load %arg21[%150, %c0_80, %c0_81] : memref<8x2x32xf32, #tpu.memory_space<vmem>>, vector<1x2x32xf32>
      %152 = vector.shape_cast %151 : vector<1x2x32xf32> to vector<2x32xf32>
      %153 = arith.index_cast %arg24 : i32 to index
      %c0_82 = arith.constant 0 : index
      %c0_83 = arith.constant 0 : index
      %154 = vector.load %arg22[%153, %c0_82, %c0_83] : memref<8x2x32xf32, #tpu.memory_space<vmem>>, vector<1x2x32xf32>
      %155 = vector.shape_cast %154 : vector<1x2x32xf32> to vector<2x32xf32>
      %156 = vector.broadcast %73 : vector<1x32xf32> to vector<2x32xf32>
      %157 = arith.addf %156, %152 : vector<2x32xf32>
      %158 = arith.maximumf %arg27, %157 : vector<2x32xf32>
      %159 = arith.subf %arg27, %158 : vector<2x32xf32>
      %160 = math.exp %159 : vector<2x32xf32>
      %161 = arith.subf %157, %158 : vector<2x32xf32>
      %162 = math.exp %161 : vector<2x32xf32>
      %163 = arith.mulf %160, %arg25 : vector<2x32xf32>
      %164 = arith.mulf %162, %155 : vector<2x32xf32>
      %165 = arith.addf %163, %164 : vector<2x32xf32>
      %166 = arith.mulf %160, %arg26 : vector<2x32xf32>
      %167 = arith.addf %166, %162 : vector<2x32xf32>
      %168 = tpu.reciprocal %167 {approx = true} : vector<2x32xf32> -> vector<2x32xf32>
      %169 = arith.mulf %165, %168 : vector<2x32xf32>
      %170 = arith.index_cast %arg24 : i32 to index
      %c0_84 = arith.constant 0 : index
      %c0_85 = arith.constant 0 : index
      %171 = vector.load %arg23[%170, %c0_84, %c0_85] : memref<8x2x32xf32, #tpu.memory_space<vmem>>, vector<1x2x32xf32>
      %172 = vector.shape_cast %171 : vector<1x2x32xf32> to vector<2x32xf32>
      %173 = vector.shape_cast %169 : vector<2x32xf32> to vector<1x2x32xf32>
      tpu.vector_store %arg23[%170, %c0_84, %c0_85], %173 {strides = array<i32>} : memref<8x2x32xf32, #tpu.memory_space<vmem>>, vector<1x2x32xf32>,
      %174 = vector.broadcast %70 : vector<1x32xf32> to vector<2x32xf32>
      %175 = arith.addf %arg27, %174 : vector<2x32xf32>
      %176 = arith.maximumf %175, %152 : vector<2x32xf32>
      %177 = arith.subf %175, %176 : vector<2x32xf32>
      %178 = math.exp %177 : vector<2x32xf32>
      %179 = arith.subf %152, %176 : vector<2x32xf32>
      %180 = math.exp %179 : vector<2x32xf32>
      %181 = arith.mulf %178, %arg25 : vector<2x32xf32>
      %182 = arith.mulf %180, %155 : vector<2x32xf32>
      %183 = arith.addf %181, %182 : vector<2x32xf32>
      %184 = arith.mulf %178, %arg26 : vector<2x32xf32>
      %185 = arith.addf %184, %180 : vector<2x32xf32>
      scf.yield %183, %185, %176 : vector<2x32xf32>, vector<2x32xf32>, vector<2x32xf32>
    }
    %c8_i32_42 = arith.constant 8 : i32
    %c0_43 = arith.constant 0 : index
    %c0_44 = arith.constant 0 : index
    %c0_45 = arith.constant 0 : index
    %79 = vector.load %arg23[%c0_43, %c0_44, %c0_45] : memref<8x2x32xf32, #tpu.memory_space<vmem>>, vector<8x2x32xf32>
    %80 = vector.shape_cast %79 : vector<8x2x32xf32> to vector<16x32xf32>
    %81 = arith.truncf %80 : vector<16x32xf32> to vector<16x32xbf16>
    %82 = arith.extf %81 : vector<16x32xbf16> to vector<16x32xf32>
    %83 = arith.mulf %58, %82 : vector<16x32xf32>
    %84 = arith.truncf %83 : vector<16x32xf32> to vector<16x32xbf16>
    %c0_46 = arith.constant 0 : index
    %c0_47 = arith.constant 0 : index
    %85 = vector.load %arg12[%c0_46, %c0_47] : memref<32x32xbf16, #tpu.memory_space<vmem>>, vector<32x32xbf16>
    %cst_48 = arith.constant dense<0.000000e+00> : vector<16x32xf32>
    %86 = tpu.matmul %84, %85, %cst_48 {dimension_numbers = #tpu.dot_dimension_numbers<[1], [0], [0], [1], [0, 0, 1, 1], [], []>} : vector<16x32xbf16>, vector<32x32xbf16>, vector<16x32xf32> -> vector<16x32xf32>
    %87 = arith.addf %1, %86 : vector<16x32xf32>
    %c0_49 = arith.constant 0 : index
    %c0_50 = arith.constant 0 : index
    %88 = vector.load %arg13[%c0_49, %c0_50] : memref<1x32xf32, #tpu.memory_space<vmem>>, vector<1x32xf32>
    %c0_51 = arith.constant 0 : index
    %c0_52 = arith.constant 0 : index
    %89 = vector.load %arg14[%c0_51, %c0_52] : memref<1x32xf32, #tpu.memory_space<vmem>>, vector<1x32xf32>
    %cst_53 = arith.constant dense<0.000000e+00> : vector<16xf32>
    %90 = vector.multi_reduction <add>, %87, %cst_53 [1] : vector<16x32xf32> to vector<16xf32>
    %91 = vector.shape_cast %90 : vector<16xf32> to vector<16x1xf32>
    %cst_54 = arith.constant 3.200000e+01 : f32
    %92 = vector.broadcast %cst_54 : f32 to vector<16x1xf32>
    %93 = arith.divf %91, %92 : vector<16x1xf32>
    %94 = vector.broadcast %93 : vector<16x1xf32> to vector<16x32xf32>
    %95 = arith.subf %87, %94 : vector<16x32xf32>
    %96 = arith.mulf %95, %95 : vector<16x32xf32>
    %cst_55 = arith.constant dense<0.000000e+00> : vector<16xf32>
    %97 = vector.multi_reduction <add>, %96, %cst_55 [1] : vector<16x32xf32> to vector<16xf32>
    %98 = vector.shape_cast %97 : vector<16xf32> to vector<16x1xf32>
    %cst_56 = arith.constant 3.200000e+01 : f32
    %99 = vector.broadcast %cst_56 : f32 to vector<16x1xf32>
    %100 = arith.divf %98, %99 : vector<16x1xf32>
    %101 = vector.broadcast %93 : vector<16x1xf32> to vector<16x32xf32>
    %102 = arith.subf %87, %101 : vector<16x32xf32>
    %cst_57 = arith.constant 9.99999974E-6 : f32
    %103 = vector.broadcast %cst_57 : f32 to vector<16x1xf32>
    %104 = arith.addf %100, %103 : vector<16x1xf32>
    %105 = math.rsqrt %104 : vector<16x1xf32>
    %106 = vector.broadcast %105 : vector<16x1xf32> to vector<16x32xf32>
    %107 = arith.mulf %102, %106 : vector<16x32xf32>
    %108 = vector.broadcast %88 : vector<1x32xf32> to vector<16x32xf32>
    %109 = arith.mulf %107, %108 : vector<16x32xf32>
    %110 = vector.broadcast %89 : vector<1x32xf32> to vector<16x32xf32>
    %111 = arith.addf %109, %110 : vector<16x32xf32>
    %c2_i32_58 = arith.constant 2 : i32
    %112 = tpu.dynamic_rotate %111 by %c2_i32_58 dim 0 : vector<16x32xf32>, i32 -> vector<16x32xf32>
    %113 = tpu.iota {dimensions = array<i32: 0>} : vector<16x32xi32>
    %c2_i32_59 = arith.constant 2 : i32
    %114 = vector.broadcast %c2_i32_59 : i32 to vector<16x32xi32>
    %115 = arith.cmpi slt, %113, %114 : vector<16x32xi32>
    %cst_60 = arith.constant 0.000000e+00 : f32
    %116 = vector.broadcast %cst_60 : f32 to vector<16x32xf32>
    %117 = arith.select %115, %116, %112 : vector<16x32xi1>, vector<16x32xf32>
    %118 = arith.subf %111, %117 : vector<16x32xf32>
    %c0_61 = arith.constant 0 : index
    %c0_62 = arith.constant 0 : index
    %119 = vector.load %arg15[%c0_61, %c0_62] : memref<1x32xf32, #tpu.memory_space<vmem>>, vector<1x32xf32>
    %120 = vector.broadcast %119 : vector<1x32xf32> to vector<16x32xf32>
    %121 = arith.mulf %120, %118 : vector<16x32xf32>
    %122 = arith.addf %117, %121 : vector<16x32xf32>
    %c0_63 = arith.constant 0 : index
    %c0_64 = arith.constant 0 : index
    %123 = vector.load %arg16[%c0_63, %c0_64] : memref<1x32xf32, #tpu.memory_space<vmem>>, vector<1x32xf32>
    %124 = vector.broadcast %123 : vector<1x32xf32> to vector<16x32xf32>
    %125 = arith.mulf %124, %118 : vector<16x32xf32>
    %126 = arith.addf %117, %125 : vector<16x32xf32>
    %127 = arith.truncf %126 : vector<16x32xf32> to vector<16x32xbf16>
    %c0_65 = arith.constant 0 : index
    %c0_66 = arith.constant 0 : index
    %128 = vector.load %arg18[%c0_65, %c0_66] : memref<32x32xbf16, #tpu.memory_space<vmem>>, vector<32x32xbf16>
    %cst_67 = arith.constant dense<0.000000e+00> : vector<16x32xf32>
    %129 = tpu.matmul %127, %128, %cst_67 {dimension_numbers = #tpu.dot_dimension_numbers<[1], [0], [0], [1], [0, 0, 1, 1], [], []>} : vector<16x32xbf16>, vector<32x32xbf16>, vector<16x32xf32> -> vector<16x32xf32>
    %130 = arith.negf %129 : vector<16x32xf32>
    %131 = math.exp %130 : vector<16x32xf32>
    %cst_68 = arith.constant 1.000000e+00 : f32
    %132 = vector.broadcast %cst_68 : f32 to vector<16x32xf32>
    %133 = arith.addf %132, %131 : vector<16x32xf32>
    %134 = arith.divf %132, %133 : vector<16x32xf32>
    %135 = arith.truncf %122 : vector<16x32xf32> to vector<16x32xbf16>
    %cst_69 = arith.constant 0.000000e+00 : f32
    %136 = vector.broadcast %cst_69 : f32 to vector<16x32xf32>
    %c0_70 = arith.constant 0 : index
    %c0_71 = arith.constant 0 : index
    %137 = vector.load %arg17[%c0_70, %c0_71] : memref<32x128xbf16, #tpu.memory_space<vmem>>, vector<32x128xbf16>
    %cst_72 = arith.constant dense<0.000000e+00> : vector<16x128xf32>
    %138 = tpu.matmul %135, %137, %cst_72 {dimension_numbers = #tpu.dot_dimension_numbers<[1], [0], [0], [1], [0, 0, 1, 1], [], []>} : vector<16x32xbf16>, vector<32x128xbf16>, vector<16x128xf32> -> vector<16x128xf32>
    %cst_73 = arith.constant 0.000000e+00 : f32
    %139 = vector.broadcast %cst_73 : f32 to vector<16x128xf32>
    %140 = arith.maximumf %138, %139 : vector<16x128xf32>
    %141 = arith.mulf %140, %140 : vector<16x128xf32>
    %142 = arith.truncf %141 : vector<16x128xf32> to vector<16x128xbf16>
    %c0_74 = arith.constant 0 : index
    %c0_75 = arith.constant 0 : index
    %143 = vector.load %arg19[%c0_74, %c0_75] : memref<128x32xbf16, #tpu.memory_space<vmem>>, vector<128x32xbf16>
    %cst_76 = arith.constant dense<0.000000e+00> : vector<16x32xf32>
    %144 = tpu.matmul %142, %143, %cst_76 {dimension_numbers = #tpu.dot_dimension_numbers<[1], [0], [0], [1], [0, 0, 1, 1], [], []>} : vector<16x128xbf16>, vector<128x32xbf16>, vector<16x32xf32> -> vector<16x32xf32>
    %145 = arith.addf %136, %144 : vector<16x32xf32>
    %146 = arith.mulf %134, %145 : vector<16x32xf32>
    %147 = arith.addf %87, %146 : vector<16x32xf32>
    %148 = vector.shape_cast %147 : vector<16x32xf32> to vector<8x2x32xf32>
    %c0_77 = arith.constant 0 : index
    %c0_78 = arith.constant 0 : index
    %c0_79 = arith.constant 0 : index
    %149 = vector.load %arg20[%c0_77, %c0_78, %c0_79] : memref<8x2x32xf32, #tpu.memory_space<vmem>>, vector<8x2x32xf32>
    tpu.vector_store %arg20[%c0_77, %c0_78, %c0_79], %148 {strides = array<i32>} : memref<8x2x32xf32, #tpu.memory_space<vmem>>, vector<8x2x32xf32>,
    return
  }
  func.func @transform_0(%arg0: i32) -> (i32, i32, i32) {
    %c0_i32 = arith.constant 0 : i32
    %c0_i32_0 = arith.constant 0 : i32
    %c0_i32_1 = arith.constant 0 : i32
    return %c0_i32, %arg0, %c0_i32_0 : i32, i32, i32
  }
  func.func @transform_1(%arg0: i32) -> (i32, i32) {
    %c0_i32 = arith.constant 0 : i32
    %c0_i32_0 = arith.constant 0 : i32
    %c0_i32_1 = arith.constant 0 : i32
    return %c0_i32, %c0_i32_0 : i32, i32
  }
  func.func @transform_2(%arg0: i32) -> (i32, i32) {
    %c0_i32 = arith.constant 0 : i32
    %c0_i32_0 = arith.constant 0 : i32
    %c0_i32_1 = arith.constant 0 : i32
    return %c0_i32, %c0_i32_0 : i32, i32
  }
  func.func @transform_3(%arg0: i32) -> (i32, i32) {
    %c0_i32 = arith.constant 0 : i32
    %c0_i32_0 = arith.constant 0 : i32
    %c0_i32_1 = arith.constant 0 : i32
    return %c0_i32, %c0_i32_0 : i32, i32
  }
  func.func @transform_4(%arg0: i32) -> (i32, i32) {
    %c0_i32 = arith.constant 0 : i32
    %c0_i32_0 = arith.constant 0 : i32
    %c0_i32_1 = arith.constant 0 : i32
    return %c0_i32, %c0_i32_0 : i32, i32
  }
  func.func @transform_5(%arg0: i32) -> (i32, i32) {
    %c0_i32 = arith.constant 0 : i32
    %c0_i32_0 = arith.constant 0 : i32
    %c0_i32_1 = arith.constant 0 : i32
    return %c0_i32, %c0_i32_0 : i32, i32
  }
  func.func @transform_6(%arg0: i32) -> (i32, i32) {
    %c0_i32 = arith.constant 0 : i32
    %c0_i32_0 = arith.constant 0 : i32
    %c0_i32_1 = arith.constant 0 : i32
    return %c0_i32, %c0_i32_0 : i32, i32
  }
  func.func @transform_7(%arg0: i32) -> (i32, i32) {
    %c0_i32 = arith.constant 0 : i32
    %c0_i32_0 = arith.constant 0 : i32
    %c0_i32_1 = arith.constant 0 : i32
    return %c0_i32, %c0_i32_0 : i32, i32
  }
  func.func @transform_8(%arg0: i32) -> (i32, i32) {
    %c0_i32 = arith.constant 0 : i32
    %c0_i32_0 = arith.constant 0 : i32
    %c0_i32_1 = arith.constant 0 : i32
    return %c0_i32, %c0_i32_0 : i32, i32
  }
  func.func @transform_9(%arg0: i32) -> (i32, i32) {
    %c0_i32 = arith.constant 0 : i32
    %c0_i32_0 = arith.constant 0 : i32
    %c0_i32_1 = arith.constant 0 : i32
    return %c0_i32, %c0_i32_0 : i32, i32
  }
  func.func @transform_10(%arg0: i32) -> (i32, i32) {
    %c0_i32 = arith.constant 0 : i32
    %c0_i32_0 = arith.constant 0 : i32
    %c0_i32_1 = arith.constant 0 : i32
    return %c0_i32, %c0_i32_0 : i32, i32
  }
  func.func @transform_11(%arg0: i32) -> (i32, i32) {
    %c0_i32 = arith.constant 0 : i32
    %c0_i32_0 = arith.constant 0 : i32
    %c0_i32_1 = arith.constant 0 : i32
    return %c0_i32, %c0_i32_0 : i32, i32
  }
  func.func @transform_12(%arg0: i32) -> (i32, i32) {
    %c0_i32 = arith.constant 0 : i32
    %c0_i32_0 = arith.constant 0 : i32
    %c0_i32_1 = arith.constant 0 : i32
    return %c0_i32, %c0_i32_0 : i32, i32
  }
  func.func @transform_13(%arg0: i32) -> (i32, i32) {
    %c0_i32 = arith.constant 0 : i32
    %c0_i32_0 = arith.constant 0 : i32
    %c0_i32_1 = arith.constant 0 : i32
    return %c0_i32, %c0_i32_0 : i32, i32
  }
  func.func @transform_14(%arg0: i32) -> (i32, i32) {
    %c0_i32 = arith.constant 0 : i32
    %c0_i32_0 = arith.constant 0 : i32
    %c0_i32_1 = arith.constant 0 : i32
    return %c0_i32, %c0_i32_0 : i32, i32
  }
  func.func @transform_15(%arg0: i32) -> (i32, i32) {
    %c0_i32 = arith.constant 0 : i32
    %c0_i32_0 = arith.constant 0 : i32
    %c0_i32_1 = arith.constant 0 : i32
    return %c0_i32, %c0_i32_0 : i32, i32
  }
  func.func @transform_16(%arg0: i32) -> (i32, i32) {
    %c0_i32 = arith.constant 0 : i32
    %c0_i32_0 = arith.constant 0 : i32
    %c0_i32_1 = arith.constant 0 : i32
    return %c0_i32, %c0_i32_0 : i32, i32
  }
  func.func @transform_17(%arg0: i32) -> (i32, i32) {
    %c0_i32 = arith.constant 0 : i32
    %c0_i32_0 = arith.constant 0 : i32
    %c0_i32_1 = arith.constant 0 : i32
    return %c0_i32, %c0_i32_0 : i32, i32
  }
  func.func @transform_18(%arg0: i32) -> (i32, i32) {
    %c0_i32 = arith.constant 0 : i32
    %c0_i32_0 = arith.constant 0 : i32
    %c0_i32_1 = arith.constant 0 : i32
    return %c0_i32, %c0_i32_0 : i32, i32
  }
  func.func @transform_19(%arg0: i32) -> (i32, i32, i32) {
    %c0_i32 = arith.constant 0 : i32
    %c0_i32_0 = arith.constant 0 : i32
    %c0_i32_1 = arith.constant 0 : i32
    return %c0_i32, %arg0, %c0_i32_0 : i32, i32, i32
  }
}

</mosaic_0001>

<bundles_post_ra>
// kernel: tpu_custom_call.1
= control target key start
LH: loop header
LB: loop body
LE: loop exit
PB: predicated region body
PF: predicated region fallthrough
CT: control target
= control target key end

     0   :  { %s3309_s0 = inlined_call_operand.vmem [shape: f32[8,2,32], index: 0, kind: input, shape index: {}]   ;;  %s3310_s1 = inlined_call_operand.hbm [shape: f32[1,32], index: 1, kind: input, shape index: {}]   ;;  %s3311_s2 = inlined_call_operand.hbm [shape: f32[1,32], index: 2, kind: input, shape index: {}]   ;;  %s3312_s3 = inlined_call_operand.hbm [shape: f32[1,32], index: 3, kind: input, shape index: {}]   ;;  %s3313_s4 = inlined_call_operand.hbm [shape: f32[1,32], index: 4, kind: input, shape index: {}]   ;;  %s3314_s5 = inlined_call_operand.hbm [shape: f32[1,32], index: 5, kind: input, shape index: {}]   ;;  %s3315_s6 = inlined_call_operand.hbm [shape: f32[1,32], index: 6, kind: input, shape index: {}]   ;;  %s3316_s7 = inlined_call_operand.hbm [shape: f32[1,32], index: 7, kind: input, shape index: {}]   ;;  %s3317_s8 = inlined_call_operand.vmem [shape: bf16[32,32], index: 8, kind: input, shape index: {}]   ;;  %s3318_s9 = inlined_call_operand.vmem [shape: bf16[32,32], index: 9, kind: input, shape index: {}]   ;;  %s3319_s10 = inlined_call_operand.vmem [shape: bf16[32,32], index: 10, kind: input, shape index: {}]   ;;  %s3320_s11 = inlined_call_operand.vmem [shape: bf16[32,32], index: 11, kind: input, shape index: {}]   ;;  %s3321_s12 = inlined_call_operand.hbm [shape: f32[1,32], index: 12, kind: input, shape index: {}]   ;;  %s3322_s13 = inlined_call_operand.hbm [shape: f32[1,32], index: 13, kind: input, shape index: {}]   ;;  %s3323_s14 = inlined_call_operand.hbm [shape: f32[1,32], index: 14, kind: input, shape index: {}]   ;;  %s3324_s15 = inlined_call_operand.hbm [shape: f32[1,32], index: 15, kind: input, shape index: {}]   ;;  %s3325_s16 = inlined_call_operand.vmem [shape: bf16[32,128], index: 16, kind: input, shape index: {}]   ;;  %s3326_s17 = inlined_call_operand.hbm [shape: bf16[32,32], index: 17, kind: input, shape index: {}]   ;;  %s3327_s18 = inlined_call_operand.vmem [shape: bf16[128,32], index: 18, kind: input, shape index: {}]   ;;  %s3328_s19 = inlined_call_operand.hbm [shape: f32[8,2,32], index: 19, kind: output, shape index: {}]  }
   0x1   :  { %3330 = sst [smem:[#allocation34_spill]] %s3309_s0 }
   0x2   :  { %3331 = sst [smem:[#allocation35_spill]] %s3310_s1 }
   0x3   :  { %3332 = sst [smem:[#allocation36_spill]] %s3311_s2 }
   0x4   :  { %3333 = sst [smem:[#allocation37_spill]] %s3312_s3 }
   0x5   :  { %24 = vsyncpa [#allocation6], 0 }
   0x6   :  { %25 = vsyncpa [#allocation9], 0 }
   0x7   :  { %26 = vsyncpa [#allocation12], 0 }
   0x8   :  { %27 = vsyncpa [#allocation15], 0 }
   0x9   :  { %28 = vsyncpa [#allocation18], 0 }
   0xa   :  { %29 = vsyncpa [#allocation21], 0 }
   0xb   :  { %30 = vsyncpa [#allocation24], 0 }
   0xc   :  { %31 = vsyncpa [#allocation7], 0  ;;  %s2676_s0 = smov [#allocation8]   ;;  %s2677_s20 = smov [#allocation11]  }
   0xd   :  { %s50_s30 = sshll.u32 %s2676_s0, 4  ;;  %s70_s21 = sshll.u32 %s2677_s20, 4  ;;  %s51_s30 = int_to_ptr.vmem [resolvable:$true] %s50_s30  ;;  %s71_s21 = int_to_ptr.vmem [resolvable:$true] %s70_s21 }
   0xe   :  { %s2376_s1 = scalar_lea.vmem %s51_s30, 16  ;;  %s2380_s22 = scalar_lea.vmem %s51_s30, 32 }
   0xf   :  { %p2377_p0 = scmp.ne.s32.totalorder %s51_s30, %s2376_s1  ;;  %p2381_p1 = scmp.lt.s32.totalorder %s51_s30, %s51_s30 }
  0x10   :  { %p2382_p2 = scmp.lt.s32.totalorder %s2380_s22, %s2376_s1 }
  0x12   :  { %p2383_p3 = por %p2382_p2, %p2381_p1 }
  0x14   :  { %p2384_p4 = pnand %p2383_p3, %p2377_p0 }
  0x16   :  { %2387 = shalt.err (!%p2384_p4)
}
  0x17   :  { %s3334_s24 = sld [smem:[#allocation36_spill]]  ;;  %s2396_s25 = scalar_lea.vmem %s71_s21, 16 }
  0x18   :  { %p2397_p5 = scmp.ne.s32.totalorder %s71_s21, %s2396_s25  ;;  %s2400_s3 = scalar_lea.vmem %s71_s21, 32 }
  0x19   :  { %p2401_p6 = scmp.lt.s32.totalorder %s71_s21, %s71_s21  ;;  %p2402_p7 = scmp.lt.s32.totalorder %s2400_s3, %s2396_s25 }
  0x1b   :  { %p2403_p8 = por %p2402_p7, %p2401_p6 }
  0x1d   :  { %53 = dma.hbm_to_vmem [thread:$0]  %s3334_s24, 16, %s51_s30, [#allocation9]  }
  0x1e   :  { %p2404_p9 = pnand %p2403_p8, %p2397_p5 }
  0x20   :  { %2407 = shalt.err (!%p2404_p9)
}
  0x21   :  { %73 = dma.hbm_to_vmem [thread:$0]  %s3313_s4, 16, %s71_s21, [#allocation12]  }
  0x22   :  { %s2678_s28 = smov [#allocation14]   ;;  %s2679_s0 = smov [#allocation17]  }
  0x23   :  { %s90_s29 = sshll.u32 %s2678_s28, 4  ;;  %s118_s20 = sshll.u32 %s2679_s0, 4  ;;  %s91_s29 = int_to_ptr.vmem [resolvable:$true] %s90_s29  ;;  %s119_s20 = int_to_ptr.vmem [resolvable:$true] %s118_s20 }
  0x24   :  { %s2416_s1 = scalar_lea.vmem %s91_s29, 16  ;;  %s2420_s30 = scalar_lea.vmem %s91_s29, 32 }
  0x25   :  { %p2417_p10 = scmp.ne.s32.totalorder %s91_s29, %s2416_s1  ;;  %p2421_p11 = scmp.lt.s32.totalorder %s91_s29, %s91_s29 }
  0x26   :  { %p2422_p12 = scmp.lt.s32.totalorder %s2420_s30, %s2416_s1 }
  0x28   :  { %p2423_p13 = por %p2422_p12, %p2421_p11 }
  0x2a   :  { %p2424_p0 = pnand %p2423_p13, %p2417_p10 }
  0x2c   :  { %2427 = shalt.err (!%p2424_p0)
}
  0x2d   :  { %93 = dma.hbm_to_vmem [thread:$0]  %s3315_s6, 16, %s91_s29, [#allocation15]  }
  0x2e   :  { %s2436_s23 = scalar_lea.vmem %s119_s20, 16  ;;  %s2440_s4 = scalar_lea.vmem %s119_s20, 32 }
  0x2f   :  { %p2437_p1 = scmp.ne.s32.totalorder %s119_s20, %s2436_s23  ;;  %p2441_p2 = scmp.lt.s32.totalorder %s119_s20, %s119_s20 }
  0x30   :  { %p2442_p3 = scmp.lt.s32.totalorder %s2440_s4, %s2436_s23 }
  0x32   :  { %p2443_p4 = por %p2442_p3, %p2441_p2 }
  0x34   :  { %p2444_p5 = pnand %p2443_p4, %p2437_p1 }
  0x36   :  { %2447 = shalt.err (!%p2444_p5)
}
  0x37   :  { %121 = dma.hbm_to_vmem [thread:$0]  %s3321_s12, 16, %s119_s20, [#allocation18]  }
  0x38   :  { %s2680_s25 = smov [#allocation20]   ;;  %s2681_s26 = smov [#allocation5]  }
  0x39   :  { %s138_s3 = sshll.u32 %s2680_s25, 4  ;;  %s40_s27 = sshll.u32 %s2681_s26, 4  ;;  %s139_s3 = int_to_ptr.vmem [resolvable:$true] %s138_s3  ;;  %s41_s27 = int_to_ptr.vmem [resolvable:$true] %s40_s27 }
  0x3a   :  { %s2456_s28 = scalar_lea.vmem %s139_s3, 16  ;;  %s2460_s6 = scalar_lea.vmem %s139_s3, 32 }
  0x3b   :  { %p2457_p6 = scmp.ne.s32.totalorder %s139_s3, %s2456_s28  ;;  %p2461_p7 = scmp.lt.s32.totalorder %s139_s3, %s139_s3 }
  0x3c   :  { %p2462_p8 = scmp.lt.s32.totalorder %s2460_s6, %s2456_s28 }
  0x3e   :  { %p2463_p9 = por %p2462_p8, %p2461_p7 }
  0x40   :  { %p2464_p10 = pnand %p2463_p9, %p2457_p6 }
  0x42   :  { %2467 = shalt.err (!%p2464_p10)
}
  0x43   :  { %141 = dma.hbm_to_vmem [thread:$0]  %s3323_s14, 16, %s139_s3, [#allocation21]  }
  0x44   :  { %s2476_s1 = scalar_lea.vmem %s41_s27, 16  ;;  %s2480_s12 = scalar_lea.vmem %s41_s27, 32 }
  0x45   :  { %p2477_p11 = scmp.ne.s32.totalorder %s41_s27, %s2476_s1  ;;  %p2481_p12 = scmp.lt.s32.totalorder %s41_s27, %s41_s27 }
  0x46   :  { %p2482_p13 = scmp.lt.s32.totalorder %s2480_s12, %s2476_s1 }
  0x48   :  { %p2483_p0 = por %p2482_p13, %p2481_p12 }
  0x4a   :  { %p2484_p1 = pnand %p2483_p0, %p2477_p11 }
  0x4c   :  { %2487 = shalt.err (!%p2484_p1)
}
  0x4d   :  { %s3335_s22 = sld [smem:[#allocation35_spill]]  ;;  %s2682_s2 = smov [#allocation10]  }
  0x4e   :  { %s60_s23 = sshll.u32 %s2682_s2, 4  ;;  %s2683_s4 = smov [#allocation13]   ;;  %s61_s23 = int_to_ptr.vmem [resolvable:$true] %s60_s23 }
  0x4f   :  { %s80_s21 = sshll.u32 %s2683_s4, 4  ;;  %s2496_s24 = scalar_lea.vmem %s61_s23, 16  ;;  %s81_s21 = int_to_ptr.vmem [resolvable:$true] %s80_s21 }
  0x50   :  { %p2497_p2 = scmp.ne.s32.totalorder %s61_s23, %s2496_s24  ;;  %s2500_s14 = scalar_lea.vmem %s61_s23, 32 }
  0x51   :  { %p2501_p3 = scmp.lt.s32.totalorder %s61_s23, %s61_s23  ;;  %p2502_p4 = scmp.lt.s32.totalorder %s2500_s14, %s2496_s24 }
  0x53   :  { %43 = dma.hbm_to_vmem [thread:$0]  %s3335_s22, 16, %s41_s27, [#allocation6]  }
  0x54   :  { %p2503_p5 = por %p2502_p4, %p2501_p3 }
  0x56   :  { %p2504_p6 = pnand %p2503_p5, %p2497_p2 }
  0x58   :  { %2507 = shalt.err (!%p2504_p6)
}
  0x59   :  { %s3336_s26 = sld [smem:[#allocation37_spill]]  ;;  %s2516_s28 = scalar_lea.vmem %s81_s21, 16 }
  0x5a   :  { %p2517_p7 = scmp.ne.s32.totalorder %s81_s21, %s2516_s28  ;;  %s2520_s27 = scalar_lea.vmem %s81_s21, 32 }
  0x5b   :  { %p2521_p8 = scmp.lt.s32.totalorder %s81_s21, %s81_s21  ;;  %p2522_p9 = scmp.lt.s32.totalorder %s2520_s27, %s2516_s28 }
  0x5d   :  { %p2523_p10 = por %p2522_p9, %p2521_p8 }
  0x5f   :  { %63 = dma.hbm_to_vmem [thread:$0]  %s3336_s26, 16, %s61_s23, [#allocation9]  }
  0x60   :  { %p2524_p11 = pnand %p2523_p10, %p2517_p7 }
  0x62   :  { %2527 = shalt.err (!%p2524_p11)
}
  0x63   :  { %83 = dma.hbm_to_vmem [thread:$0]  %s3314_s5, 16, %s81_s21, [#allocation12]  }
  0x64   :  { %s2684_s0 = smov [#allocation16]   ;;  %s2685_s12 = smov [#allocation19]  }
  0x65   :  { %s100_s1 = sshll.u32 %s2684_s0, 4  ;;  %s128_s20 = sshll.u32 %s2685_s12, 4  ;;  %s101_s1 = int_to_ptr.vmem [resolvable:$true] %s100_s1  ;;  %s129_s20 = int_to_ptr.vmem [resolvable:$true] %s128_s20 }
  0x66   :  { %s2536_s30 = scalar_lea.vmem %s101_s1, 16  ;;  %s2540_s22 = scalar_lea.vmem %s101_s1, 32 }
  0x67   :  { %p2537_p12 = scmp.ne.s32.totalorder %s101_s1, %s2536_s30  ;;  %p2541_p13 = scmp.lt.s32.totalorder %s101_s1, %s101_s1 }
  0x68   :  { %p2542_p0 = scmp.lt.s32.totalorder %s2540_s22, %s2536_s30 }
  0x6a   :  { %p2543_p1 = por %p2542_p0, %p2541_p13 }
  0x6c   :  { %p2544_p2 = pnand %p2543_p1, %p2537_p12 }
  0x6e   :  { %2547 = shalt.err (!%p2544_p2)
}
  0x6f   :  { %103 = dma.hbm_to_vmem [thread:$0]  %s3316_s7, 16, %s101_s1, [#allocation15]  }
  0x70   :  { %s2556_s4 = scalar_lea.vmem %s129_s20, 16  ;;  %s2560_s5 = scalar_lea.vmem %s129_s20, 32 }
  0x71   :  { %p2557_p3 = scmp.ne.s32.totalorder %s129_s20, %s2556_s4  ;;  %p2561_p4 = scmp.lt.s32.totalorder %s129_s20, %s129_s20 }
  0x72   :  { %p2562_p5 = scmp.lt.s32.totalorder %s2560_s5, %s2556_s4 }
  0x74   :  { %p2563_p6 = por %p2562_p5, %p2561_p4 }
  0x76   :  { %p2564_p7 = pnand %p2563_p6, %p2557_p3 }
  0x78   :  { %2567 = shalt.err (!%p2564_p7)
}
  0x79   :  { %131 = dma.hbm_to_vmem [thread:$0]  %s3322_s13, 16, %s129_s20, [#allocation18]  }
  0x7a   :  { %s2686_s14 = smov [#allocation22]   ;;  %s2687_s3 = smov [#allocation23]  }
  0x7b   :  { %s148_s25 = sshll.u32 %s2686_s14, 4  ;;  %s159_s26 = sshll.u32 %s2687_s3, 4  ;;  %s149_s25 = int_to_ptr.vmem [resolvable:$true] %s148_s25  ;;  %s160_s26 = int_to_ptr.vmem [resolvable:$true] %s159_s26 }
  0x7c   :  { %s2576_s28 = scalar_lea.vmem %s149_s25, 16  ;;  %s2580_s7 = scalar_lea.vmem %s149_s25, 32 }
  0x7d   :  { %p2577_p8 = scmp.ne.s32.totalorder %s149_s25, %s2576_s28  ;;  %p2581_p9 = scmp.lt.s32.totalorder %s149_s25, %s149_s25 }
  0x7e   :  { %p2582_p10 = scmp.lt.s32.totalorder %s2580_s7, %s2576_s28 }
  0x80   :  { %p2583_p11 = por %p2582_p10, %p2581_p9 }
  0x82   :  { %p2584_p12 = pnand %p2583_p11, %p2577_p8 }
  0x84   :  { %2587 = shalt.err (!%p2584_p12)
}
  0x85   :  { %151 = dma.hbm_to_vmem [thread:$0]  %s3324_s15, 16, %s149_s25, [#allocation21]  }
  0x86   :  { %s2596_s29 = scalar_lea.vmem %s160_s26, 256  ;;  %p2601_p0 = scmp.lt.s32.totalorder %s160_s26, %s160_s26 }
  0x87   :  { %p2597_p13 = scmp.ne.s32.totalorder %s160_s26, %s2596_s29  ;;  %p2602_p1 = scmp.lt.s32.totalorder %s2596_s29, %s2596_s29 }
  0x89   :  { %p2603_p2 = por %p2602_p1, %p2601_p0 }
  0x8b   :  { %p2604_p3 = pnand %p2603_p2, %p2597_p13 }
  0x8d   :  { %2607 = shalt.err (!%p2604_p3)
}
  0x8e   :  { %s2688_s13 = smov 64   ;;  %s2689_s0 = smov 4  }
  0x8f   :  { %165 = dma.hbm_to_vmem [thread:$0]  %s3326_s17, 256, %s160_s26, [#allocation24], %s2688_s13, %s2688_s13, %s2689_s0  }
  0x90   :  { %2644 = dma.done.wait [#allocation6], 16  }
  0x91   :  { %2645 = vsyncadd [#allocation6], 4294967280 }
  0x92   :  { %2646 = dma.done.wait [#allocation9], 32  }
  0x93   :  { %2647 = vsyncadd [#allocation9], 4294967264 }
  0x94   :  { %2648 = dma.done.wait [#allocation12], 32  }
  0x95   :  { %2649 = vsyncadd [#allocation12], 4294967264 }
  0x96   :  { %2650 = dma.done.wait [#allocation15], 32  }
  0x97   :  { %2651 = vsyncadd [#allocation15], 4294967264 }
  0x98   :  { %2652 = dma.done.wait [#allocation18], 32  }
  0x99   :  { %2653 = vsyncadd [#allocation18], 4294967264 }
  0x9a   :  { %2654 = dma.done.wait [#allocation21], 32  }
  0x9b   :  { %2655 = vsyncadd [#allocation21], 4294967264 }
  0x9c   :  { %2656 = dma.done.wait [#allocation24], 256  }
  0x9d   :  { %2657 = vsyncadd [#allocation24], 4294967040  ;;  %v228_v0 = vlaneseq  ;;  %v2690_v1 = vmov 1983009808   ;;  %vm259_vm0 = vcmask 261120   ;;  %s3337_s20 = sld [smem:[#allocation34_spill]] }
  0x9e   :  { %v226_v2 = vunpack.c.l.s4 %v2690_v1  ;;  %v1039_v5 = vld [vmem:[#allocation14] sm:$0x1]  ;;  %v1043_v6 = vld [vmem:[#allocation16] sm:$0x1]  ;;  %v2691_v33 = vmov 269488144  }
  0x9f   :  { %v2836_v4 = vshrl.u32 %v228_v0, 7  ;;  %v1040_v9 = vmul.f32 1.442695, %v1039_v5  ;;  %v1044_v10 = vpack.c.bf16 %v1043_v6, %v1043_v6  ;;  %v272_v34 = vunpack.c.l.s4 %v2691_v33 }
  0xa0   :  { %v227_v3 = vunpack.c.0.s8 %v226_v2  ;;  %v2692_v35 = vmov 842150450   ;;  %v2693_v37 = vmov 1414812756   ;;  %v2694_v39 = vmov 1987475062  }
  0xa1   :  { %2318 = vpow2.f32 %v1040_v9  ;;  %v2873_v17 = vunpack.c.l.bf16 %v1044_v10  ;;  %v279_v36 = vunpack.c.l.s4 %v2692_v35  ;;  %v286_v38 = vunpack.c.l.s4 %v2693_v37 }
  0xa2   :  { %v2844_v8 = vsub.s32 %v227_v3, %v2836_v4  ;;  %v293_v40 = vunpack.c.l.s4 %v2694_v39  ;;  %v273_v41 = vunpack.c.0.s8 %v272_v34  ;;  %v2695_v39 = vmov 0.0  }
  0xa3   :  { %v2841_v7 = vld [vmem:[%s3337_s20] sm:$0x3]  ;;  %v2849_v11 = vld [vmem:[%s3337_s20 + $0x2] sm:$0x3]  ;;  %v2854_v12 = vld [vmem:[%s3337_s20 + $0x4] sm:$0x3]  ;;  %v280_v42 = vunpack.c.0.s8 %v279_v36  ;;  %v287_v43 = vunpack.c.0.s8 %v286_v38  ;;  %2188 = vmatprep.subr.bf16.mxu1 %v2695_v39 }
  0xa4   :  { %v2859_v13 = vld [vmem:[%s3337_s20 + $0x6] sm:$0x3]  ;;  %v223_v14 = vcombine.low %v2841_v7, %v2849_v11  ;;  %v2866_v15 = vld [vmem:[%s3337_s20 + $0x8] sm:$0x3]  ;;  %v2871_v16 = vld [vmem:[%s3337_s20 + $0xa] sm:$0x3]  ;;  %v294_v44 = vunpack.c.0.s8 %v293_v40  ;;  %v2901_v45 = vsub.s32 %v273_v41, %v2836_v4 }
  0xa5   :  { %v224_v18 = vcombine.low %v2854_v12, %v2859_v13  ;;  %v2880_v19 = vld [vmem:[%s3337_s20 + $0xc] sm:$0x3]  ;;  %v2885_v20 = vld [vmem:[%s3337_s20 + $0xe] sm:$0x3]  ;;  %v240_v21 = vcombine.low %v2866_v15, %v2871_v16  ;;  %v2904_v46 = vsub.s32 %v280_v42, %v2836_v4  ;;  %v2907_v47 = vsub.s32 %v287_v43, %v2836_v4  ;;  %v2313_v40 = vld [vmem:[%s3317_s8] sm:$0xff]  }
  0xa6   :  { %v231_v22 = vrot.slane %v223_v14, %v2844_v8  ;;  %v241_v23 = vcombine.low %v2880_v19, %v2885_v20  ;;  %v2910_v48 = vsub.s32 %v294_v44, %v2836_v4  ;;  %v2312_v38 = vld [vmem:[%s3317_s8 + $0x8] sm:$0xff]   ;;  %vm2696_vm1 = vmmov 0  }
  0xa7   :  { %v238_v24 = vrot.slane %v224_v18, %v2844_v8  ;;  %v248_v25 = vrot.slane %v240_v21, %v2844_v8  ;;  %2192 = vmatprep.mubr.msk.bf16.mxu1 %vm2696_vm1, %v2695_v39  ;;  %2189 = vmatpush3.bf16.msra.mxu1 %v2312_v38  ;;  %vm597_vm2 = vcmp.lt.s32.totalorder %v2836_v4, 2  ;;  %vm975_vm3 = vcmask 254976  }
  0xa8   :  { %v255_v26 = vrot.slane %v241_v23, %v2844_v8  ;;  %2190 = vmatprep.subr.bf16.mxu1 %v2695_v39 }
  0xa9   :  { %v239_v27 = vcombine.low %v231_v22, %v238_v24 }
  0xaa   :  { %v256_v28 = vcombine.low %v248_v25, %v255_v26 }
  0xab   :  { %v260_v29 = vsel %vm259_vm0, %v239_v27, 0.0  ;;  %2191 = vmatpush3.bf16.msra.mxu1 %v2313_v40 }
  0xac   :  { %261 = vadd.xlane.f32.xlu0 %v260_v29  ;;  %v263_v30 = vsel %vm259_vm0, %v256_v28, 0.0  ;;  %2196 = vmatprep.subr.bf16.mxu1 %v2695_v39 }
  0xae   :  { %v2897_v31 = vpop.eup %2318 }
  0xaf   :  { %v1042_v32 = vsub.f32 0.0, %v2897_v31 }
  0xb0   :  { %264 = vadd.xlane.f32.xlu0 %v263_v30 }
 0x135   :  { %v262_v49 = vpop.xlane.xlu0 %261 }
 0x136   :  { %v267_v50 = vmul.f32 0.03125, %v262_v49 }
 0x138   :  { %v277_v51 = vrot.slane %v267_v50, %v2901_v45  ;;  %v284_v52 = vrot.slane %v267_v50, %v2904_v46  ;;  %v291_v53 = vrot.slane %v267_v50, %v2907_v47  ;;  %v298_v54 = vrot.slane %v267_v50, %v2910_v48 }
 0x139   :  { %v265_v55 = vpop.xlane.xlu0 %264 }
 0x13a   :  { %v268_v56 = vmul.f32 0.03125, %v265_v55  ;;  %v2917_v57 = vsub.f32 %v2841_v7, %v277_v51  ;;  %v2920_v58 = vsub.f32 %v2849_v11, %v284_v52  ;;  %v2923_v59 = vsub.f32 %v2854_v12, %v291_v53  ;;  %v2121_v51 = vld [vmem:[#allocation5] ss:$0 sm:$0xff]  ;;  %v2122_v52 = vld [vmem:[#allocation8] ss:$0 sm:$0xff] }
 0x13b   :  { %v2926_v60 = vsub.f32 %v2859_v13, %v298_v54  ;;  %v486_v53 = vcombine.high %v2121_v51, %v2121_v51  ;;  %v520_v54 = vcombine.high %v2122_v52, %v2122_v52  ;;  %v493_v55 = vrot.slane %v2121_v51, %v2844_v8 }
 0x13c   :  { %v305_v61 = vrot.slane %v268_v56, %v2901_v45  ;;  %v312_v62 = vrot.slane %v268_v56, %v2904_v46  ;;  %v319_v63 = vrot.slane %v268_v56, %v2907_v47  ;;  %v326_v0 = vrot.slane %v268_v56, %v2910_v48 }
 0x13d   :  { %v343_v1 = vmul.f32 %v2917_v57, %v2917_v57  ;;  %v344_v2 = vmul.f32 %v2920_v58, %v2920_v58  ;;  %v345_v3 = vmul.f32 %v2923_v59, %v2923_v59  ;;  %v346_v5 = vmul.f32 %v2926_v60, %v2926_v60 }
 0x13e   :  { %v2941_v6 = vsub.f32 %v2866_v15, %v305_v61  ;;  %v2944_v9 = vsub.f32 %v2871_v16, %v312_v62  ;;  %v2947_v10 = vsub.f32 %v2880_v19, %v319_v63  ;;  %v2950_v14 = vsub.f32 %v2885_v20, %v326_v0 }
 0x13f   :  { %v359_v18 = vcombine.low %v343_v1, %v344_v2  ;;  %v360_v21 = vcombine.low %v345_v3, %v346_v5  ;;  %v500_v56 = vrot.slane %v486_v53, %v2844_v8  ;;  %v527_v62 = vrot.slane %v2122_v52, %v2844_v8 }
 0x140   :  { %v347_v22 = vmul.f32 %v2941_v6, %v2941_v6  ;;  %v348_v23 = vmul.f32 %v2944_v9, %v2944_v9  ;;  %v349_v24 = vmul.f32 %v2947_v10, %v2947_v10  ;;  %v350_v25 = vmul.f32 %v2950_v14, %v2950_v14 }
 0x141   :  { %v367_v26 = vrot.slane %v359_v18, %v2844_v8  ;;  %v374_v27 = vrot.slane %v360_v21, %v2844_v8  ;;  %v534_v63 = vrot.slane %v520_v54, %v2844_v8  ;;  %v501_v5 = vcombine.high %v493_v55, %v493_v55 }
 0x142   :  { %v376_v28 = vcombine.low %v347_v22, %v348_v23  ;;  %v377_v29 = vcombine.low %v349_v24, %v350_v25  ;;  %v502_v18 = vcombine.high %v500_v56, %v500_v56 }
 0x143   :  { %v375_v30 = vcombine.low %v367_v26, %v374_v27  ;;  %v535_v26 = vcombine.high %v527_v62, %v527_v62  ;;  %v536_v27 = vcombine.high %v534_v63, %v534_v63 }
 0x144   :  { %v384_v33 = vrot.slane %v376_v28, %v2844_v8  ;;  %v391_v34 = vrot.slane %v377_v29, %v2844_v8 }
 0x145   :  { %v395_v35 = vsel %vm259_vm0, %v375_v30, 0.0 }
 0x146   :  { %396 = vadd.xlane.f32.xlu1 %v395_v35  ;;  %v392_v36 = vcombine.low %v384_v33, %v391_v34 }
 0x148   :  { %v398_v37 = vsel %vm259_vm0, %v392_v36, 0.0 }
 0x14a   :  { %399 = vadd.xlane.f32.xlu1 %v398_v37 }
 0x1cf   :  { %v397_v41 = vpop.xlane.xlu1 %396 }
 0x1d0   :  { %v401_v42 = vmul.f32 0.03125, %v397_v41 }
 0x1d2   :  { %v403_v43 = vadd.f32 1e-05, %v401_v42 }
 0x1d3   :  { %v400_v44 = vpop.xlane.xlu1 %399 }
 0x1d4   :  { %2320 = vrsqrt.f32 %v403_v43  ;;  %v402_v49 = vmul.f32 0.03125, %v400_v44 }
 0x1d6   :  { %v404_v50 = vadd.f32 1e-05, %v402_v49 }
 0x1d8   :  { %2322 = vrsqrt.f32 %v404_v50 }
 0x1e1   :  { %v2321_v61 = vpop.eup %2320 }
 0x1e2   :  { %v415_v0 = vrot.slane %v2321_v61, %v2901_v45  ;;  %v422_v1 = vrot.slane %v2321_v61, %v2904_v46  ;;  %v429_v2 = vrot.slane %v2321_v61, %v2907_v47  ;;  %v436_v3 = vrot.slane %v2321_v61, %v2910_v48 }
 0x1e4   :  { %v473_v21 = vmul.f32 %v415_v0, %v2917_v57  ;;  %v474_v22 = vmul.f32 %v422_v1, %v2920_v58  ;;  %v475_v23 = vmul.f32 %v429_v2, %v2923_v59  ;;  %v476_v24 = vmul.f32 %v436_v3, %v2926_v60 }
 0x1e5   :  { %v2323_v25 = vpop.eup %2322 }
 0x1e6   :  { %v443_v28 = vrot.slane %v2323_v25, %v2901_v45  ;;  %v450_v29 = vrot.slane %v2323_v25, %v2904_v46  ;;  %v457_v30 = vrot.slane %v2323_v25, %v2907_v47  ;;  %v464_v33 = vrot.slane %v2323_v25, %v2910_v48 }
 0x1e7   :  { %v507_v34 = vmul.f32 %v493_v55, %v473_v21  ;;  %v508_v35 = vmul.f32 %v501_v5, %v474_v22  ;;  %v509_v57 = vmul.f32 %v500_v56, %v475_v23  ;;  %v510_v36 = vmul.f32 %v502_v18, %v476_v24 }
 0x1e8   :  { %v477_v58 = vmul.f32 %v443_v28, %v2941_v6  ;;  %v478_v59 = vmul.f32 %v450_v29, %v2944_v9  ;;  %v479_v60 = vmul.f32 %v457_v30, %v2947_v10  ;;  %v480_v37 = vmul.f32 %v464_v33, %v2950_v14 }
 0x1e9   :  { %v541_v38 = vadd.f32 %v527_v62, %v507_v34  ;;  %v542_v40 = vadd.f32 %v535_v26, %v508_v35  ;;  %v543_v41 = vadd.f32 %v534_v63, %v509_v57  ;;  %v544_v42 = vadd.f32 %v536_v27, %v510_v36 }
 0x1ea   :  { %v511_v43 = vmul.f32 %v493_v55, %v477_v58  ;;  %v512_v44 = vmul.f32 %v501_v5, %v478_v59  ;;  %v513_v49 = vmul.f32 %v500_v56, %v479_v60  ;;  %v514_v50 = vmul.f32 %v502_v18, %v480_v37 }
 0x1eb   :  { %v557_v51 = vcombine.low %v541_v38, %v542_v40  ;;  %v558_v52 = vcombine.low %v543_v41, %v544_v42 }
 0x1ec   :  { %v545_v53 = vadd.f32 %v527_v62, %v511_v43  ;;  %v546_v54 = vadd.f32 %v535_v26, %v512_v44  ;;  %v547_v61 = vadd.f32 %v534_v63, %v513_v49  ;;  %v548_v6 = vadd.f32 %v536_v27, %v514_v50 }
 0x1ed   :  { %v565_v9 = vrot.slane %v557_v51, %v2844_v8  ;;  %v572_v10 = vrot.slane %v558_v52, %v2844_v8  ;;  %v2123_v52 = vld [vmem:[#allocation10] ss:$0 sm:$0xff] }
 0x1ee   :  { %v574_v0 = vcombine.low %v545_v53, %v546_v54  ;;  %v575_v14 = vcombine.low %v547_v61, %v548_v6 }
 0x1ef   :  { %v573_v1 = vcombine.low %v565_v9, %v572_v10  ;;  %v2124_v10 = vld [vmem:[#allocation11] ss:$0 sm:$0xff] }
 0x1f0   :  { %v582_v2 = vrot.slane %v574_v0, %v2844_v8  ;;  %v589_v55 = vrot.slane %v575_v14, %v2844_v8 }
 0x1f1   :  { %v593_v56 = vrot.slane %v573_v1, 6 }
 0x1f2   :  { %v590_v3 = vcombine.low %v582_v2, %v589_v55  ;;  %v2315_v2 = vld [vmem:[%s3318_s9] sm:$0xff]  }
 0x1f4   :  { %v594_v5 = vrot.slane %v590_v3, 6 }
 0x1f6   :  { %v598_v62 = vsel %vm597_vm2, %v593_v56, %v594_v5  ;;  %v599_v63 = vsel %vm597_vm2, %v594_v5, %v593_v56  ;;  %v2125_v56 = vld [vmem:[#allocation13] ss:$0 sm:$0xff]  ;;  %v2316_v5 = vld [vmem:[%s3319_s10 + $0x8] sm:$0xff]  }
 0x1f7   :  { %v602_v18 = vsel %vm597_vm2, 0.0, %v599_v63  ;;  %v623_v21 = vcombine.high %v598_v62, %v598_v62  ;;  %v630_v22 = vrot.slane %v598_v62, %v2844_v8 }
 0x1f8   :  { %v606_v23 = vcombine.high %v602_v18, %v602_v18  ;;  %v613_v24 = vrot.slane %v602_v18, %v2844_v8 }
 0x1f9   :  { %v637_v25 = vrot.slane %v623_v21, %v2844_v8  ;;  %v638_v26 = vcombine.high %v630_v22, %v630_v22  ;;  %v652_v30 = vsub.f32 %v545_v53, %v630_v22 }
 0x1fa   :  { %v620_v27 = vrot.slane %v606_v23, %v2844_v8  ;;  %v621_v28 = vcombine.high %v613_v24, %v613_v24  ;;  %v648_v35 = vsub.f32 %v541_v38, %v613_v24  ;;  %v2317_v23 = vld [vmem:[%s3319_s10] sm:$0xff]   ;;  %s3066_s10 = smov 0  }
 0x1fb   :  { %v639_v29 = vcombine.high %v637_v25, %v637_v25  ;;  %v653_v33 = vsub.f32 %v546_v54, %v638_v26  ;;  %v654_v36 = vsub.f32 %v547_v61, %v637_v25 }
 0x1fc   :  { %v622_v34 = vcombine.high %v620_v27, %v620_v27  ;;  %v649_v57 = vsub.f32 %v542_v40, %v621_v28  ;;  %v650_v60 = vsub.f32 %v543_v41, %v620_v27 }
 0x1fd   :  { %v655_v58 = vsub.f32 %v548_v6, %v639_v29  ;;  %v688_v59 = vcombine.low %v652_v30, %v653_v33 }
 0x1fe   :  { %v651_v37 = vsub.f32 %v544_v42, %v622_v34  ;;  %v671_v43 = vcombine.low %v648_v35, %v649_v57  ;;  %v2314_v42 = vld [vmem:[%s3318_s9 + $0x8] sm:$0xff]  }
 0x1ff   :  { %v689_v44 = vcombine.low %v654_v36, %v655_v58  ;;  %v696_v50 = vrot.slane %v688_v59, %v2844_v8 }
 0x200   :  { %v672_v49 = vcombine.low %v650_v60, %v651_v37  ;;  %v679_v9 = vrot.slane %v671_v43, %v2844_v8 }
 0x201   :  { %v703_v51 = vrot.slane %v689_v44, %v2844_v8 }
 0x202   :  { %v686_v53 = vrot.slane %v672_v49, %v2844_v8 }
 0x203   :  { %v704_v54 = vcombine.low %v696_v50, %v703_v51 }
 0x204   :  { %v687_v38 = vcombine.low %v679_v9, %v686_v53 }
 0x205   :  { %v708_v40 = vmul.f32 %v2123_v52, %v704_v54  ;;  %v719_v1 = vmul.f32 %v2124_v10, %v704_v54  ;;  %v730_v22 = vmul.f32 %v2125_v56, %v704_v54 }
 0x206   :  { %v707_v61 = vmul.f32 %v2123_v52, %v687_v38  ;;  %v718_v14 = vmul.f32 %v2124_v10, %v687_v38  ;;  %v729_v21 = vmul.f32 %v2125_v56, %v687_v38 }
 0x207   :  { %v710_v6 = vadd.f32 %v708_v40, %v598_v62  ;;  %v721_v3 = vadd.f32 %v719_v1, %v598_v62  ;;  %v732_v25 = vadd.f32 %v730_v22, %v598_v62 }
 0x208   :  { %v709_v41 = vadd.f32 %v707_v61, %v602_v18  ;;  %v720_v55 = vadd.f32 %v718_v14, %v602_v18  ;;  %v731_v24 = vadd.f32 %v729_v21, %v602_v18 }
 0x20a   :  { %v733_v0 = vpack.c.bf16 %v710_v6, %v709_v41  ;;  %v794_v63 = vpack.c.bf16 %v721_v3, %v720_v55  ;;  %v855_v26 = vpack.c.bf16 %v732_v25, %v731_v24 }
 0x20c   :  { %2193 = vmatmul.mubr.msk.bf16.vlgmr.msra.gmra.mxu1 %vm259_vm0, %v733_v0 }
 0x20d   :  { %2197 = vmatpush3.bf16.msra.mxu1 %v2314_v42  ;;  %2200 = vmatprep.mubr.msk.bf16.mxu1 %vm2696_vm1, %v2695_v39 }
 0x20e   :  { %2198 = vmatprep.subr.bf16.mxu1 %v2695_v39 }
 0x211   :  { %2199 = vmatpush3.bf16.msra.mxu1 %v2315_v2 }
 0x212   :  { %2204 = vmatprep.subr.bf16.mxu1 %v2695_v39 }
 0x214   :  { %2201 = vmatmul.mubr.msk.bf16.vlgmr.msra.gmra.mxu1 %vm259_vm0, %v794_v63 }
 0x215   :  { %2205 = vmatpush3.bf16.msra.mxu1 %v2316_v5  ;;  %2208 = vmatprep.mubr.msk.bf16.mxu1 %vm2696_vm1, %v2695_v39 }
 0x216   :  { %2206 = vmatprep.subr.bf16.mxu1 %v2695_v39 }
 0x219   :  { %2207 = vmatpush3.bf16.msra.mxu1 %v2317_v23 }
 0x21c   :  { %2209 = vmatmul.mubr.msk.bf16.vlgmr.msra.gmra.mxu1 %vm259_vm0, %v855_v26 }
 0x2cc   :  { %v787_v27 = vpop.f32.mrf.mxu1 }
 0x2ce   :  { %v2194_v28 = vpop.f32.mrf.mxu1 }
 0x2cf   :  { %v2664_v28 = vmov 0.0  }
 0x2d0   :  { %v790_v29 = vpop.f32.mrf.mxu1 }
 0x2d1   :  { %v928_v30 = vpack.c.bf16 %v790_v29, %v787_v27  ;;  %v2660_v27 = vmov -1e+38   ;;  %v2668_v29 = vmov 0.0  }
 0x2d2   :  { %v2195_v33 = vpop.f32.mrf.mxu1 }
 0x2d3   :  { %v929_v34 = vunpack.c.l.bf16 %v928_v30  ;;  %v930_v35 = vunpack.c.h.bf16 %v928_v30 }
 0x2d4   :  { %v848_v57 = vpop.f32.mrf.mxu1 }
 0x2d5   :  { %v933_v36 = vcombine.high %v929_v34, %v929_v34  ;;  %v940_v58 = vrot.slane %v929_v34, %v2844_v8  ;;  %v950_v59 = vcombine.high %v930_v35, %v930_v35  ;;  %v957_v18 = vrot.slane %v930_v35, %v2844_v8 }
 0x2d6   :  { %v2202_v62 = vpop.f32.mrf.mxu1 }
 0x2d7   :  { %v947_v60 = vrot.slane %v933_v36, %v2844_v8  ;;  %v948_v37 = vcombine.high %v940_v58, %v940_v58  ;;  %v964_v43 = vrot.slane %v950_v59, %v2844_v8  ;;  %v965_v44 = vcombine.high %v957_v18, %v957_v18  ;;  %976 = vst.msk [vmem:[#allocation2] sm:$0x3] %vm975_vm3, %v940_v58 }
 0x2d8   :  { %980 = vst.msk [vmem:[#allocation2 + $0x8] sm:$0x3] %vm975_vm3, %v957_v18  ;;  %v851_v49 = vpop.f32.mrf.mxu1 }
 0x2d9   :  { %v949_v50 = vcombine.high %v947_v60, %v947_v60  ;;  %v966_v51 = vcombine.high %v964_v43, %v964_v43  ;;  %977 = vst.msk [vmem:[#allocation2 + $0x2] sm:$0x3] %vm975_vm3, %v948_v37  ;;  %978 = vst.msk [vmem:[#allocation2 + $0x4] sm:$0x3] %vm975_vm3, %v947_v60  ;;  %v984_v52 = vpack.c.bf16 %v851_v49, %v848_v57 }
 0x2da   :  { %981 = vst.msk [vmem:[#allocation2 + $0xa] sm:$0x3] %vm975_vm3, %v965_v44  ;;  %982 = vst.msk [vmem:[#allocation2 + $0xc] sm:$0x3] %vm975_vm3, %v964_v43  ;;  %v2203_v9 = vpop.f32.mrf.mxu1 }
 0x2db   :  { %979 = vst.msk [vmem:[#allocation2 + $0x6] sm:$0x3] %vm975_vm3, %v949_v50  ;;  %983 = vst.msk [vmem:[#allocation2 + $0xe] sm:$0x3] %vm975_vm3, %v966_v51  ;;  %v985_v53 = vunpack.c.l.bf16 %v984_v52  ;;  %v986_v54 = vunpack.c.h.bf16 %v984_v52 }
 0x2dc   :  { %v909_v38 = vpop.f32.mrf.mxu1 }
 0x2dd   :  { %v989_v40 = vcombine.high %v985_v53, %v985_v53  ;;  %v996_v61 = vrot.slane %v985_v53, %v2844_v8  ;;  %v1006_v6 = vcombine.high %v986_v54, %v986_v54  ;;  %v1013_v10 = vrot.slane %v986_v54, %v2844_v8 }
 0x2de   :  { %v2135_v41 = vmul.f32 -1.442695, %v909_v38  ;;  %v2210_v42 = vpop.f32.mrf.mxu1 }
 0x2df   :  { %v1003_v0 = vrot.slane %v989_v40, %v2844_v8  ;;  %v1004_v14 = vcombine.high %v996_v61, %v996_v61  ;;  %v1020_v1 = vrot.slane %v1006_v6, %v2844_v8  ;;  %v1021_v2 = vcombine.high %v1013_v10, %v1013_v10  ;;  %1031 = vst.msk [vmem:[#allocation3] sm:$0x3] %vm975_vm3, %v996_v61 }
 0x2e0   :  { %1035 = vst.msk [vmem:[#allocation3 + $0x8] sm:$0x3] %vm975_vm3, %v1013_v10  ;;  %2324 = vpow2.f32 %v2135_v41  ;;  %v912_v55 = vpop.f32.mrf.mxu1 }
 0x2e1   :  { %v1005_v3 = vcombine.high %v1003_v0, %v1003_v0  ;;  %v1022_v56 = vcombine.high %v1020_v1, %v1020_v1  ;;  %1032 = vst.msk [vmem:[#allocation3 + $0x2] sm:$0x3] %vm975_vm3, %v1004_v14  ;;  %1033 = vst.msk [vmem:[#allocation3 + $0x4] sm:$0x3] %vm975_vm3, %v1003_v0  ;;  %v2136_v5 = vmul.f32 -1.442695, %v912_v55 }
 0x2e2   :  { %1036 = vst.msk [vmem:[#allocation3 + $0xa] sm:$0x3] %vm975_vm3, %v1021_v2  ;;  %1037 = vst.msk [vmem:[#allocation3 + $0xc] sm:$0x3] %vm975_vm3, %v1020_v1  ;;  %v2211_v63 = vpop.f32.mrf.mxu1 }
 0x2e3   :  { %1034 = vst.msk [vmem:[#allocation3 + $0x6] sm:$0x3] %vm975_vm3, %v1005_v3  ;;  %1038 = vst.msk [vmem:[#allocation3 + $0xe] sm:$0x3] %vm975_vm3, %v1022_v56  ;;  %2326 = vpow2.f32 %v2136_v5 }
 0x2ed   :  { %v2325_v21 = vpop.eup %2324 }
 0x2ee   :  { %v922_v22 = vadd.f32 1.0, %v2325_v21 }
 0x2f0   :  { %v2327_v23 = vpop.eup %2326  ;;  %2328 = vrcp.f32 %v922_v22 }
 0x2f1   :  { %v923_v24 = vadd.f32 1.0, %v2327_v23 }
 0x2f3   :  { %2330 = vrcp.f32 %v923_v24 }
 0x2fd   :  { %v3062_v25 = vpop.eup %2328 }
 0x300   :  { %v3064_v26 = vpop.eup %2330 }
 0x301 LB: > { %v1062_v30 = vsub.s32 0, %v2836_v4  ;;  %s3073_s30 = sshll.u32 %s2674_s10, 1  ;;  %s1051_s10 = sadd.s32 1, %s2674_s10   ;;  %s2674_s10 = sphi %s3066_s10, %s1051_s10   ;;  %v2670_v29 = vphi %v2668_v29, %v2669_v29   ;;  %v2666_v28 = vphi %v2664_v28, %v1099_v28   ;;  %v2662_v27 = vphi %v2660_v27, %v2661_v27  }
 0x302   : > { %s1056_s22 = scalar_lea.vmem [#allocation2], %s3073_s30  ;;  %s1058_s2 = scalar_lea.vmem [#allocation3], %s3073_s30 }
 0x303   : > { %v1063_v33 = vrot.slane %v2873_v17, %v1062_v30  ;;  %v1085_v34 = vrot.slane %v1042_v32, %v1062_v30  ;;  %v1057_v35 = vld [vmem:[%s1056_s22] sm:$0x3]  ;;  %s1079_s23 = scalar_lea.vmem [#allocation4], %s3073_s30  ;;  %p1048_p4 = scmp.ge.s32.totalorder %s1051_s10, 8  }
 0x304   : > { %v1059_v61 = vld [vmem:[%s1058_s2] sm:$0x3]  ;;  %2212 = vmatprep.subr.bf16.mxu1 (%p1048_p4), %v2695_v39  ;;  %v2342_v55 = vld [vmem:[%s3320_s11 + $0x8] sm:$0xff] (%p1048_p4)   ;;  %2216 = vmatprep.mubr.msk.bf16.mxu1 (%p1048_p4), %vm2696_vm1, %v2695_v39 }
 0x305   : > { %v1087_v57 = vadd.f32 %v2662_v27, %v1085_v34  ;;  %v1064_v36 = vadd.f32 %v1063_v33, %v1057_v35  ;;  %v2343_v3 = vld [vmem:[%s3320_s11] sm:$0xff] (%p1048_p4)   ;;  %2220 = vmatprep.subr.bf16.mxu0 (%p1048_p4), %v2695_v39  ;;  %2224 = vmatprep.mubr.msk.bf16.mxu0 (%p1048_p4), %vm2696_vm1, %v2695_v39 }
 0x306   :  { %2213 = vmatpush3.bf16.msra.mxu1 (%p1048_p4), %v2342_v55 }
 0x307   : > { %v1088_v58 = vmax.f32 %v1087_v57, %v1057_v35   ;;  %v1065_v59 = vmax.f32 %v2662_v27, %v1064_v36  ;;  %2214 = vmatprep.subr.bf16.mxu1 (%p1048_p4), %v2695_v39 }
 0x309   : > { %v1089_v18 = vsub.f32 %v1087_v57, %v1088_v58  ;;  %v1092_v62 = vsub.f32 %v1057_v35, %v1088_v58  ;;  %v1066_v60 = vsub.f32 %v2662_v27, %v1065_v59  ;;  %v1069_v37 = vsub.f32 %v1064_v36, %v1065_v59 }
 0x30a   : > { %v2661_v27 = vmov %v1088_v58   ;;  %2215 = vmatpush3.bf16.msra.mxu1 (%p1048_p4), %v2343_v3 }
 0x30b   : > { %v1090_v43 = vmul.f32 1.442695, %v1089_v18  ;;  %v1067_v44 = vmul.f32 1.442695, %v1066_v60  ;;  %v1070_v49 = vmul.f32 1.442695, %v1069_v37  ;;  %2228 = vmatprep.subr.bf16.mxu1 (%p1048_p4), %v2695_v39 }
 0x30c   : > { %v1093_v50 = vmul.f32 1.442695, %v1092_v62 }
 0x30d   : > { %2332 = vpow2.f32 %v1090_v43 }
 0x30e   : > { %2334 = vpow2.f32 %v1067_v44 }
 0x30f   : > { %2336 = vpow2.f32 %v1070_v49 }
 0x310   : > { %2338 = vpow2.f32 %v1093_v50 }
 0x31a   : > { %v2333_v51 = vpop.eup %2332 }
 0x31b   : > { %v2335_v52 = vpop.eup %2334  ;;  %v1098_v9 = vmul.f32 %v2666_v28, %v2333_v51  ;;  %v1095_v38 = vmul.f32 %v2670_v29, %v2333_v51 }
 0x31c   : > { %v2337_v53 = vpop.eup %2336  ;;  %v1075_v54 = vmul.f32 %v2666_v28, %v2335_v52  ;;  %v1072_v42 = vmul.f32 %v2670_v29, %v2335_v52 }
 0x31d   : > { %v2339_v40 = vpop.eup %2338  ;;  %v1073_v0 = vmul.f32 %v2337_v53, %v1059_v61 }
 0x31e   : > { %v1076_v6 = vadd.f32 %v2337_v53, %v1075_v54  ;;  %v1096_v10 = vmul.f32 %v2339_v40, %v1059_v61  ;;  %v1099_v28 = vadd.f32 %v2339_v40, %v1098_v9  }
 0x31f   : > { %v1074_v14 = vadd.f32 %v1073_v0, %v1072_v42 }
 0x320   : > { %2340 = vrcp.f32 %v1076_v6  ;;  %v1097_v41 = vadd.f32 %v1096_v10, %v1095_v38  }
 0x322   : > { %v2669_v29 = vmov %v1097_v41  }
 0x32c   :  { %1050 = sbr.rel (!%p1048_p4) target bundleno = 769 (0x301), region = 154 }
 0x32d   : > { %v2341_v1 = vpop.eup %2340 }
 0x32e   : > { %v1078_v2 = vmul.f32 %v2341_v1, %v1074_v14 }
 0x330   : > { %1080 = vst.msk [vmem:[%s1079_s23] sm:$0x3] %vm975_vm3, %v1078_v2 }
 0x337   :  { %v1100_v56 = vld [vmem:[#allocation4] sm:$0x3]  ;;  %v1101_v17 = vld [vmem:[#allocation4 + $0x2] sm:$0x3]  ;;  %v1102_v31 = vld [vmem:[#allocation4 + $0x4] sm:$0x3] }
 0x338   :  { %v1103_v32 = vld [vmem:[#allocation4 + $0x6] sm:$0x3]  ;;  %v1104_v5 = vld [vmem:[#allocation4 + $0x8] sm:$0x3]  ;;  %v1105_v63 = vld [vmem:[#allocation4 + $0xa] sm:$0x3]  ;;  %v1116_v21 = vcombine.low %v1100_v56, %v1101_v17 }
 0x339   :  { %v1106_v22 = vld [vmem:[#allocation4 + $0xc] sm:$0x3]  ;;  %v1107_v23 = vld [vmem:[#allocation4 + $0xe] sm:$0x3]  ;;  %v1117_v24 = vcombine.low %v1102_v31, %v1103_v32  ;;  %v1133_v27 = vcombine.low %v1104_v5, %v1105_v63 }
 0x33a   :  { %v1124_v28 = vrot.slane %v1116_v21, %v2844_v8  ;;  %v1134_v29 = vcombine.low %v1106_v22, %v1107_v23 }
 0x33b   :  { %v1131_v30 = vrot.slane %v1117_v24, %v2844_v8  ;;  %v1141_v33 = vrot.slane %v1133_v27, %v2844_v8 }
 0x33c   :  { %v1148_v34 = vrot.slane %v1134_v29, %v2844_v8 }
 0x33d   :  { %v1132_v35 = vcombine.low %v1124_v28, %v1131_v30 }
 0x33e   :  { %v1149_v57 = vcombine.low %v1141_v33, %v1148_v34 }
 0x340   :  { %v1152_v36 = vpack.c.bf16 %v1149_v57, %v1132_v35 }
 0x342   :  { %v1153_v58 = vunpack.c.l.bf16 %v1152_v36  ;;  %v1154_v59 = vunpack.c.h.bf16 %v1152_v36 }
 0x344   :  { %v1155_v18 = vmul.f32 %v3062_v25, %v1153_v58  ;;  %v1156_v62 = vmul.f32 %v3064_v26, %v1154_v59 }
 0x346   :  { %v1157_v60 = vpack.c.bf16 %v1156_v62, %v1155_v18 }
 0x348   :  { %2217 = vmatmul.mubr.msk.bf16.vlgmr.msra.gmra.mxu1 %vm259_vm0, %v1157_v60 }
 0x349   :  { %2232 = vmatprep.mubr.msk.bf16.mxu1 %vm2696_vm1, %v2695_v39 }
 0x408   :  { %v1211_v37 = vpop.f32.mrf.mxu1 }
 0x409   :  { %v1220_v43 = vcombine.high %v1211_v37, %v1211_v37  ;;  %v1227_v44 = vrot.slane %v1211_v37, %v2844_v8 }
 0x40a   :  { %v2218_v49 = vpop.f32.mrf.mxu1 }
 0x40b   :  { %v1234_v50 = vrot.slane %v1220_v43, %v2844_v8  ;;  %v1235_v51 = vcombine.high %v1227_v44, %v1227_v44  ;;  %v3111_v25 = vadd.f32 %v1227_v44, %v2841_v7 }
 0x40c   :  { %v1214_v52 = vpop.f32.mrf.mxu1 }
 0x40d   :  { %v1236_v9 = vcombine.high %v1234_v50, %v1234_v50  ;;  %v3114_v26 = vadd.f32 %v1235_v51, %v2849_v11  ;;  %v1237_v53 = vcombine.high %v1214_v52, %v1214_v52  ;;  %v1244_v54 = vrot.slane %v1214_v52, %v2844_v8 }
 0x40e   :  { %v2219_v38 = vpop.f32.mrf.mxu1  ;;  %v3118_v40 = vadd.f32 %v1234_v50, %v2854_v12 }
 0x40f   :  { %v3121_v61 = vadd.f32 %v1236_v9, %v2859_v13  ;;  %v1251_v6 = vrot.slane %v1237_v53, %v2844_v8  ;;  %v1280_v10 = vcombine.low %v3111_v25, %v3114_v26  ;;  %v1252_v7 = vcombine.high %v1244_v54, %v1244_v54 }
 0x410   :  { %v3129_v42 = vadd.f32 %v1244_v54, %v2866_v15 }
 0x411   :  { %v1253_v41 = vcombine.high %v1251_v6, %v1251_v6  ;;  %v1281_v11 = vcombine.low %v3118_v40, %v3121_v61  ;;  %v3132_v0 = vadd.f32 %v1252_v7, %v2871_v16  ;;  %v3135_v12 = vadd.f32 %v1251_v6, %v2880_v19 }
 0x412   :  { %v1288_v14 = vrot.slane %v1280_v10, %v2844_v8 }
 0x413   :  { %v3138_v13 = vadd.f32 %v1253_v41, %v2885_v20  ;;  %v1295_v1 = vrot.slane %v1281_v11, %v2844_v8  ;;  %v1297_v2 = vcombine.low %v3129_v42, %v3132_v0 }
 0x415   :  { %v1296_v55 = vcombine.low %v1288_v14, %v1295_v1  ;;  %v1298_v15 = vcombine.low %v3135_v12, %v3138_v13  ;;  %v1305_v3 = vrot.slane %v1297_v2, %v2844_v8  ;;  %v2344_v1 = vld [vmem:[%s3325_s16 + $0x8] sm:$0xff]  }
 0x416   :  { %v2345_v2 = vld [vmem:[#allocation23 + $0x8] sm:$0xff]   ;;  %2229 = vmatpush3.bf16.msra.mxu1 %v2344_v1 }
 0x417   :  { %v1316_v16 = vsel %vm259_vm0, %v1296_v55, 0.0  ;;  %v1312_v19 = vrot.slane %v1298_v15, %v2844_v8  ;;  %2221 = vmatpush3.bf16.msra.mxu0 %v2345_v2  ;;  %v2346_v55 = vld [vmem:[%s3325_s16] sm:$0xff]   ;;  %2230 = vmatprep.subr.bf16.mxu1 %v2695_v39 }
 0x418   :  { %1317 = vadd.xlane.f32.xlu0 %v1316_v16  ;;  %v2347_v15 = vld [vmem:[#allocation23] sm:$0xff]   ;;  %2222 = vmatprep.subr.bf16.mxu0 %v2695_v39 }
 0x419   :  { %v1313_v20 = vcombine.low %v1305_v3, %v1312_v19 }
 0x41a   :  { %2231 = vmatpush3.bf16.msra.mxu1 %v2346_v55 }
 0x41b   :  { %v1319_v56 = vsel %vm259_vm0, %v1313_v20, 0.0  ;;  %2223 = vmatpush3.bf16.msra.mxu0 %v2347_v15 }
 0x41c   :  { %1320 = vadd.xlane.f32.xlu0 %v1319_v56  ;;  %2236 = vmatprep.subr.bf16.mxu0 %v2695_v39 }
 0x4a1   :  { %v1318_v17 = vpop.xlane.xlu0 %1317 }
 0x4a2   :  { %v1322_v31 = vmul.f32 0.03125, %v1318_v17 }
 0x4a4   :  { %v1332_v32 = vrot.slane %v1322_v31, %v2901_v45  ;;  %v1339_v5 = vrot.slane %v1322_v31, %v2904_v46  ;;  %v1346_v63 = vrot.slane %v1322_v31, %v2907_v47  ;;  %v1353_v21 = vrot.slane %v1322_v31, %v2910_v48  ;;  %v2141_v31 = vld [vmem:[#allocation17] ss:$0 sm:$0xff] }
 0x4a5   :  { %v1321_v22 = vpop.xlane.xlu0 %1320 }
 0x4a6   :  { %v1323_v23 = vmul.f32 0.03125, %v1321_v22  ;;  %v3155_v24 = vsub.f32 %v3111_v25, %v1332_v32  ;;  %v3158_v27 = vsub.f32 %v3114_v26, %v1339_v5  ;;  %v3161_v28 = vsub.f32 %v3118_v40, %v1346_v63  ;;  %v2142_v32 = vld [vmem:[#allocation19] ss:$0 sm:$0xff] }
 0x4a7   :  { %v3164_v29 = vsub.f32 %v3121_v61, %v1353_v21  ;;  %v1541_v5 = vcombine.high %v2141_v31, %v2141_v31  ;;  %v1575_v63 = vcombine.high %v2142_v32, %v2142_v32  ;;  %v1548_v21 = vrot.slane %v2141_v31, %v2844_v8 }
 0x4a8   :  { %v1360_v30 = vrot.slane %v1323_v23, %v2901_v45  ;;  %v1367_v33 = vrot.slane %v1323_v23, %v2904_v46  ;;  %v1374_v34 = vrot.slane %v1323_v23, %v2907_v47  ;;  %v1381_v35 = vrot.slane %v1323_v23, %v2910_v48 }
 0x4a9   :  { %v1398_v57 = vmul.f32 %v3155_v24, %v3155_v24  ;;  %v1399_v36 = vmul.f32 %v3158_v27, %v3158_v27  ;;  %v1400_v58 = vmul.f32 %v3161_v28, %v3161_v28  ;;  %v1401_v59 = vmul.f32 %v3164_v29, %v3164_v29 }
 0x4aa   :  { %v3179_v18 = vsub.f32 %v3129_v42, %v1360_v30  ;;  %v3182_v62 = vsub.f32 %v3132_v0, %v1367_v33  ;;  %v3185_v60 = vsub.f32 %v3135_v12, %v1374_v34  ;;  %v3188_v37 = vsub.f32 %v3138_v13, %v1381_v35 }
 0x4ab   :  { %v1414_v43 = vcombine.low %v1398_v57, %v1399_v36  ;;  %v1415_v44 = vcombine.low %v1400_v58, %v1401_v59  ;;  %v1555_v22 = vrot.slane %v1541_v5, %v2844_v8  ;;  %v1582_v30 = vrot.slane %v2142_v32, %v2844_v8 }
 0x4ac   :  { %v1402_v49 = vmul.f32 %v3179_v18, %v3179_v18  ;;  %v1403_v50 = vmul.f32 %v3182_v62, %v3182_v62  ;;  %v1404_v51 = vmul.f32 %v3185_v60, %v3185_v60  ;;  %v1405_v52 = vmul.f32 %v3188_v37, %v3188_v37 }
 0x4ad   :  { %v1422_v9 = vrot.slane %v1414_v43, %v2844_v8  ;;  %v1429_v53 = vrot.slane %v1415_v44, %v2844_v8  ;;  %v1589_v33 = vrot.slane %v1575_v63, %v2844_v8  ;;  %v1556_v58 = vcombine.high %v1548_v21, %v1548_v21 }
 0x4ae   :  { %v1431_v54 = vcombine.low %v1402_v49, %v1403_v50  ;;  %v1432_v38 = vcombine.low %v1404_v51, %v1405_v52  ;;  %v1557_v59 = vcombine.high %v1555_v22, %v1555_v22  ;;  %v1590_v52 = vcombine.high %v1582_v30, %v1582_v30 }
 0x4af   :  { %v1430_v6 = vcombine.low %v1422_v9, %v1429_v53  ;;  %v1591_v9 = vcombine.high %v1589_v33, %v1589_v33 }
 0x4b0   :  { %v1439_v10 = vrot.slane %v1431_v54, %v2844_v8  ;;  %v1446_v7 = vrot.slane %v1432_v38, %v2844_v8 }
 0x4b1   :  { %v1450_v41 = vsel %vm259_vm0, %v1430_v6, 0.0 }
 0x4b2   :  { %1451 = vadd.xlane.f32.xlu1 %v1450_v41  ;;  %v1447_v11 = vcombine.low %v1439_v10, %v1446_v7 }
 0x4b4   :  { %v1453_v14 = vsel %vm259_vm0, %v1447_v11, 0.0 }
 0x4b6   :  { %1454 = vadd.xlane.f32.xlu1 %v1453_v14 }
 0x53b   :  { %v1452_v16 = vpop.xlane.xlu1 %1451 }
 0x53c   :  { %v1456_v3 = vmul.f32 0.03125, %v1452_v16 }
 0x53e   :  { %v1458_v19 = vadd.f32 1e-05, %v1456_v3 }
 0x53f   :  { %v1455_v20 = vpop.xlane.xlu1 %1454 }
 0x540   :  { %2356 = vrsqrt.f32 %v1458_v19  ;;  %v1457_v56 = vmul.f32 0.03125, %v1455_v20 }
 0x542   :  { %v1459_v17 = vadd.f32 1e-05, %v1457_v56 }
 0x544   :  { %2358 = vrsqrt.f32 %v1459_v17 }
 0x54d   :  { %v2357_v23 = vpop.eup %2356 }
 0x54e   :  { %v1470_v34 = vrot.slane %v2357_v23, %v2901_v45  ;;  %v1477_v35 = vrot.slane %v2357_v23, %v2904_v46  ;;  %v1484_v57 = vrot.slane %v2357_v23, %v2907_v47  ;;  %v1491_v36 = vrot.slane %v2357_v23, %v2910_v48 }
 0x550   :  { %v1528_v43 = vmul.f32 %v1470_v34, %v3155_v24  ;;  %v1529_v44 = vmul.f32 %v1477_v35, %v3158_v27  ;;  %v1530_v49 = vmul.f32 %v1484_v57, %v3161_v28  ;;  %v1531_v50 = vmul.f32 %v1491_v36, %v3164_v29 }
 0x551   :  { %v2359_v51 = vpop.eup %2358 }
 0x552   :  { %v1498_v53 = vrot.slane %v2359_v51, %v2901_v45  ;;  %v1505_v54 = vrot.slane %v2359_v51, %v2904_v46  ;;  %v1512_v38 = vrot.slane %v2359_v51, %v2907_v47  ;;  %v1519_v6 = vrot.slane %v2359_v51, %v2910_v48 }
 0x553   :  { %v1562_v10 = vmul.f32 %v1548_v21, %v1528_v43  ;;  %v1563_v7 = vmul.f32 %v1556_v58, %v1529_v44  ;;  %v1564_v24 = vmul.f32 %v1555_v22, %v1530_v49  ;;  %v1565_v41 = vmul.f32 %v1557_v59, %v1531_v50 }
 0x554   :  { %v1532_v27 = vmul.f32 %v1498_v53, %v3179_v18  ;;  %v1533_v28 = vmul.f32 %v1505_v54, %v3182_v62  ;;  %v1534_v29 = vmul.f32 %v1512_v38, %v3185_v60  ;;  %v1535_v11 = vmul.f32 %v1519_v6, %v3188_v37 }
 0x555   :  { %v1596_v14 = vadd.f32 %v1582_v30, %v1562_v10  ;;  %v1597_v45 = vadd.f32 %v1590_v52, %v1563_v7  ;;  %v1598_v1 = vadd.f32 %v1589_v33, %v1564_v24  ;;  %v1599_v46 = vadd.f32 %v1591_v9, %v1565_v41 }
 0x556   :  { %v1566_v2 = vmul.f32 %v1548_v21, %v1532_v27  ;;  %v1567_v47 = vmul.f32 %v1556_v58, %v1533_v28  ;;  %v1568_v55 = vmul.f32 %v1555_v22, %v1534_v29  ;;  %v1569_v48 = vmul.f32 %v1557_v59, %v1535_v11  ;;  %v2144_v11 = vld [vmem:[#allocation22] ss:$0 sm:$0xff] }
 0x557   :  { %v1612_v15 = vcombine.low %v1596_v14, %v1597_v45  ;;  %v1613_v16 = vcombine.low %v1598_v1, %v1599_v46 }
 0x558   :  { %v1600_v3 = vadd.f32 %v1582_v30, %v1566_v2  ;;  %v1601_v19 = vadd.f32 %v1590_v52, %v1567_v47  ;;  %v1602_v20 = vadd.f32 %v1589_v33, %v1568_v55  ;;  %v1603_v18 = vadd.f32 %v1591_v9, %v1569_v48  ;;  %v2143_v2 = vld [vmem:[#allocation20] ss:$0 sm:$0xff] }
 0x559   :  { %v1620_v62 = vrot.slane %v1612_v15, %v2844_v8  ;;  %v1627_v60 = vrot.slane %v1613_v16, %v2844_v8 }
 0x55a   :  { %v1629_v56 = vcombine.low %v1600_v3, %v1601_v19  ;;  %v1630_v37 = vcombine.low %v1602_v20, %v1603_v18 }
 0x55b   :  { %v1628_v17 = vcombine.low %v1620_v62, %v1627_v60  ;;  %v2349_v62 = vld [vmem:[%s3327_s18 + $0x30] sm:$0xff]   ;;  %v2350_v60 = vld [vmem:[%s3327_s18 + $0x28] sm:$0xff]  }
 0x55c   :  { %v1637_v31 = vrot.slane %v1629_v56, %v2844_v8  ;;  %v1644_v32 = vrot.slane %v1630_v37, %v2844_v8  ;;  %v2351_v56 = vld [vmem:[%s3327_s18 + $0x20] sm:$0xff]   ;;  %v2352_v37 = vld [vmem:[%s3327_s18 + $0x18] sm:$0xff]  }
 0x55d   :  { %v1648_v63 = vrot.slane %v1628_v17, 6  ;;  %v2353_v17 = vld [vmem:[%s3327_s18 + $0x10] sm:$0xff]  }
 0x55e   :  { %v1645_v5 = vcombine.low %v1637_v31, %v1644_v32  ;;  %v2354_v31 = vld [vmem:[%s3327_s18 + $0x8] sm:$0xff]   ;;  %v2355_v32 = vld [vmem:[%s3327_s18] sm:$0xff]  }
 0x560   :  { %v1649_v21 = vrot.slane %v1645_v5, 6 }
 0x562   :  { %v1650_v22 = vsel %vm597_vm2, %v1648_v63, %v1649_v21  ;;  %v1651_v23 = vsel %vm597_vm2, %v1649_v21, %v1648_v63 }
 0x563   :  { %v1652_v30 = vsel %vm597_vm2, 0.0, %v1651_v23  ;;  %v1673_v33 = vcombine.high %v1650_v22, %v1650_v22  ;;  %v1680_v34 = vrot.slane %v1650_v22, %v2844_v8 }
 0x564   :  { %v1656_v35 = vcombine.high %v1652_v30, %v1652_v30  ;;  %v1663_v57 = vrot.slane %v1652_v30, %v2844_v8 }
 0x565   :  { %v1687_v36 = vrot.slane %v1673_v33, %v2844_v8  ;;  %v1688_v58 = vcombine.high %v1680_v34, %v1680_v34  ;;  %v1702_v49 = vsub.f32 %v1600_v3, %v1680_v34 }
 0x566   :  { %v1670_v59 = vrot.slane %v1656_v35, %v2844_v8  ;;  %v1671_v43 = vcombine.high %v1663_v57, %v1663_v57  ;;  %v1698_v52 = vsub.f32 %v1596_v14, %v1663_v57 }
 0x567   :  { %v1689_v44 = vcombine.high %v1687_v36, %v1687_v36  ;;  %v1703_v50 = vsub.f32 %v1601_v19, %v1688_v58  ;;  %v1704_v4 = vsub.f32 %v1602_v20, %v1687_v36  ;;  %v2348_v19 = vld [vmem:[%s3327_s18 + $0x38] sm:$0xff]   ;;  %s2697_s18 = smov [#allocation25]  }
 0x568   :  { %v1672_v51 = vcombine.high %v1670_v59, %v1670_v59  ;;  %v1699_v9 = vsub.f32 %v1597_v45, %v1671_v43  ;;  %v1700_v38 = vsub.f32 %v1598_v1, %v1670_v59  ;;  %s2083_s10 = sshll.u32 %s2697_s18, 4  ;;  %s2084_s10 = int_to_ptr.vmem [resolvable:$true] %s2083_s10 }
 0x569   :  { %v1705_v53 = vsub.f32 %v1603_v18, %v1689_v44  ;;  %v1738_v54 = vcombine.low %v1702_v49, %v1703_v50  ;;  %s2608_s30 = scalar_lea.vmem %s2084_s10, 256  ;;  %p2613_p6 = scmp.lt.s32.totalorder %s2084_s10, %s2084_s10 }
 0x56a   :  { %v1701_v6 = vsub.f32 %v1599_v46, %v1672_v51  ;;  %v1721_v10 = vcombine.low %v1698_v52, %v1699_v9  ;;  %p2609_p5 = scmp.ne.s32.totalorder %s2084_s10, %s2608_s30  ;;  %p2614_p7 = scmp.lt.s32.totalorder %s2608_s30, %s2608_s30 }
 0x56b   :  { %v1739_v7 = vcombine.low %v1704_v4, %v1705_v53  ;;  %v1746_v41 = vrot.slane %v1738_v54, %v2844_v8 }
 0x56c   :  { %v1722_v24 = vcombine.low %v1700_v38, %v1701_v6  ;;  %v1729_v28 = vrot.slane %v1721_v10, %v2844_v8  ;;  %p2615_p8 = por %p2614_p7, %p2613_p6 }
 0x56d   :  { %v1753_v27 = vrot.slane %v1739_v7, %v2844_v8 }
 0x56e   :  { %v1736_v29 = vrot.slane %v1722_v24, %v2844_v8  ;;  %p2616_p9 = pnand %p2615_p8, %p2609_p5 }
 0x56f   :  { %v1754_v14 = vcombine.low %v1746_v41, %v1753_v27 }
 0x570   :  { %v1737_v45 = vcombine.low %v1729_v28, %v1736_v29 }
 0x571   :  { %v1769_v47 = vmul.f32 %v2144_v11, %v1754_v14  ;;  %v1758_v55 = vmul.f32 %v2143_v2, %v1754_v14 }
 0x572   :  { %v1768_v48 = vmul.f32 %v2144_v11, %v1737_v45  ;;  %v1757_v1 = vmul.f32 %v2143_v2, %v1737_v45 }
 0x573   :  { %v1771_v46 = vadd.f32 %v1769_v47, %v1650_v22  ;;  %v1760_v15 = vadd.f32 %v1758_v55, %v1650_v22 }
 0x574   :  { %v1770_v16 = vadd.f32 %v1768_v48, %v1652_v30  ;;  %v1759_v3 = vadd.f32 %v1757_v1, %v1652_v30 }
 0x576   :  { %v1772_v20 = vpack.c.bf16 %v1771_v46, %v1770_v16  ;;  %v1845_v18 = vpack.c.bf16 %v1760_v15, %v1759_v3 }
 0x578   :  { %2225 = vmatmul.mubr.msk.bf16.vlgmr.msra.gmra.mxu0 %vm259_vm0, %v1772_v20  ;;  %2233 = vmatmul.mubr.msk.bf16.vlgmr.msra.gmra.mxu1 %vm259_vm0, %v1845_v18 }
 0x579   :  { %2237 = vmatpush3.bf16.msra.mxu0 %v2348_v19  ;;  %2252 = vmatprep.mubr.msk.bf16.mxu0 %vm2696_vm1, %v2695_v39 }
 0x57a   :  { %2238 = vmatprep.subr.bf16.mxu0 %v2695_v39 }
 0x57d   :  { %2239 = vmatpush3.bf16.msra.mxu0 %v2349_v62 }
 0x57e   :  { %2240 = vmatprep.subr.bf16.mxu0 %v2695_v39 }
 0x581   :  { %2241 = vmatpush3.bf16.msra.mxu0 %v2350_v60 }
 0x582   :  { %2242 = vmatprep.subr.bf16.mxu0 %v2695_v39 }
 0x585   :  { %2243 = vmatpush3.bf16.msra.mxu0 %v2351_v56 }
 0x586   :  { %2244 = vmatprep.subr.bf16.mxu0 %v2695_v39 }
 0x589   :  { %2245 = vmatpush3.bf16.msra.mxu0 %v2352_v37 }
 0x58a   :  { %2246 = vmatprep.subr.bf16.mxu0 %v2695_v39 }
 0x58d   :  { %2247 = vmatpush3.bf16.msra.mxu0 %v2353_v17 }
 0x58e   :  { %2248 = vmatprep.subr.bf16.mxu0 %v2695_v39 }
 0x591   :  { %2249 = vmatpush3.bf16.msra.mxu0 %v2354_v31 }
 0x592   :  { %2250 = vmatprep.subr.bf16.mxu0 %v2695_v39 }
 0x595   :  { %2251 = vmatpush3.bf16.msra.mxu0 %v2355_v32 }
 0x638   :  { %v1826_v5 = vpop.f32.mrf.mxu0  ;;  %v1899_v63 = vpop.f32.mrf.mxu1 }
 0x639   :  { %v1906_v23 = vmax.f32 %v1899_v63, 0.0  ;;  %v2148_v39 = vmul.f32 -1.442695, %v1826_v5 }
 0x63a   :  { %v2226_v21 = vpop.f32.mrf.mxu0  ;;  %v2234_v22 = vpop.f32.mrf.mxu1 }
 0x63b   :  { %v1908_v36 = vmul.f32 %v1906_v23, %v1906_v23  ;;  %2360 = vpow2.f32 %v2148_v39 }
 0x63c   :  { %v1829_v30 = vpop.f32.mrf.mxu0  ;;  %v1902_v33 = vpop.f32.mrf.mxu1 }
 0x63d   :  { %v1907_v34 = vmax.f32 %v1902_v33, 0.0  ;;  %v2149_v43 = vmul.f32 -1.442695, %v1829_v30 }
 0x63e   :  { %v2227_v35 = vpop.f32.mrf.mxu0  ;;  %v2235_v57 = vpop.f32.mrf.mxu1 }
 0x63f   :  { %v1909_v58 = vmul.f32 %v1907_v34, %v1907_v34  ;;  %2362 = vpow2.f32 %v2149_v43 }
 0x641   :  { %v1910_v59 = vpack.c.bf16 %v1909_v58, %v1908_v36 }
 0x643   :  { %2253 = vmatmul.mubr.bf16.vlgmr.msra.gmra.mxu0 %v1910_v59 }
 0x648   :  { %v2361_v44 = vpop.eup %2360 }
 0x649   :  { %v1839_v49 = vadd.f32 1.0, %v2361_v44 }
 0x64b   :  { %2364 = vrcp.f32 %v1839_v49 }
 0x64c   :  { %v2363_v50 = vpop.eup %2362 }
 0x64d   :  { %v1840_v51 = vadd.f32 1.0, %v2363_v50 }
 0x64f   :  { %2366 = vrcp.f32 %v1840_v51 }
 0x658   :  { %v2365_v52 = vpop.eup %2364 }
 0x65c   :  { %v2367_v6 = vpop.eup %2366 }
 0x703   :  { %v2009_v9 = vpop.f32.mrf.mxu0 }
 0x704   :  { %v2016_v4 = vmul.f32 %v2365_v52, %v2009_v9 }
 0x705   :  { %v2254_v53 = vpop.f32.mrf.mxu0 }
 0x706   :  { %v2020_v54 = vcombine.high %v2016_v4, %v2016_v4  ;;  %v2027_v38 = vrot.slane %v2016_v4, %v2844_v8 }
 0x707   :  { %v2012_v10 = vpop.f32.mrf.mxu0 }
 0x708   :  { %v2034_v7 = vrot.slane %v2020_v54, %v2844_v8  ;;  %v2035_v24 = vcombine.high %v2027_v38, %v2027_v38  ;;  %v2062_v41 = vadd.f32 %v2027_v38, %v3111_v25  ;;  %v2017_v27 = vmul.f32 %v2367_v6, %v2012_v10 }
 0x709   :  { %v2255_v28 = vpop.f32.mrf.mxu0 }
 0x70a   :  { %v2036_v29 = vcombine.high %v2034_v7, %v2034_v7  ;;  %v2063_v11 = vadd.f32 %v2035_v24, %v3114_v26  ;;  %v2064_v2 = vadd.f32 %v2034_v7, %v3118_v40  ;;  %2070 = vst.msk [vmem:[#allocation25] sm:$0x3] %vm975_vm3, %v2062_v41  ;;  %v2037_v14 = vcombine.high %v2017_v27, %v2017_v27 }
 0x70b   :  { %v2044_v45 = vrot.slane %v2017_v27, %v2844_v8 }
 0x70c   :  { %v2065_v47 = vadd.f32 %v2036_v29, %v3121_v61  ;;  %2071 = vst.msk [vmem:[#allocation25 + $0x2] sm:$0x3] %vm975_vm3, %v2063_v11  ;;  %2072 = vst.msk [vmem:[#allocation25 + $0x4] sm:$0x3] %vm975_vm3, %v2064_v2  ;;  %v2051_v25 = vrot.slane %v2037_v14, %v2844_v8 }
 0x70d   :  { %v2052_v55 = vcombine.high %v2044_v45, %v2044_v45  ;;  %v2066_v48 = vadd.f32 %v2044_v45, %v3129_v42 }
 0x70e   :  { %2073 = vst.msk [vmem:[#allocation25 + $0x6] sm:$0x3] %vm975_vm3, %v2065_v47  ;;  %v2053_v26 = vcombine.high %v2051_v25, %v2051_v25  ;;  %v2068_v40 = vadd.f32 %v2051_v25, %v3135_v12 }
 0x70f   :  { %v2067_v1 = vadd.f32 %v2052_v55, %v3132_v0  ;;  %2074 = vst.msk [vmem:[#allocation25 + $0x8] sm:$0x3] %vm975_vm3, %v2066_v48 }
 0x710   :  { %v2069_v61 = vadd.f32 %v2053_v26, %v3138_v13  ;;  %2076 = vst.msk [vmem:[#allocation25 + $0xc] sm:$0x3] %vm975_vm3, %v2068_v40 }
 0x711   :  { %2075 = vst.msk [vmem:[#allocation25 + $0xa] sm:$0x3] %vm975_vm3, %v2067_v1 }
 0x712   :  { %2077 = vst.msk [vmem:[#allocation25 + $0xe] sm:$0x3] %vm975_vm3, %v2069_v61 }
 0x713   :  { %2619 = shalt.err (!%p2616_p9)
}
 0x714   :  { %s2698_s22 = smov 32   ;;  %s2699_s2 = smov 2  }
 0x715   :  { %2089 = dma.vmem_to_hbm [thread:$0]  %s2084_s10, 256, %s3328_s19, [#allocation7], %s2698_s22, %s2698_s22, %s2699_s2  }
 0x716   :  { %2658 = dma.done.wait [#allocation7], 256  }
 0x717   :  { %2659 = vsyncadd [#allocation7], 4294967040 }
 0x718   :  { %2093 = vsyncpa [#allocation6], 1 }
 0x719   :  { %2094 = vsyncpa [#allocation9], 1 }
 0x71a   :  { %2095 = vsyncpa [#allocation12], 1 }
 0x71b   :  { %2096 = vsyncpa [#allocation15], 1 }
 0x71c   :  { %2097 = vsyncpa [#allocation18], 1 }
 0x71d   :  { %2098 = vsyncpa [#allocation21], 1 }
 0x71e   :  { %2099 = vsyncpa [#allocation24], 1 }
 0x71f   :  { %2100 = vsyncpa [#allocation7], 1 }

</bundles_post_ra>
